<compile_context>
chip_gen: v6e
topology: v6e:2x2x1
jax: 0.10.0
libtpu: 0.0.40
codegen_flags: <defaults>
</compile_context>

<pallas_src>
import functools

import jax
import jax.numpy as jnp
from jax.experimental import pallas as pl
from jax.experimental.pallas import tpu as pltpu


def _round_up(v, m):
    return (v + m - 1) // m * m


def _activation(v, kind):
    if kind == "relu":
        return jnp.maximum(v, 0.0)
    if kind == "leaky_relu":
        return jnp.where(v > 0, v, 0.01 * v)
    raise ValueError(f"unknown activation: {kind}")


# ---------------------------------------------------------------------------
# Fused kernel: K-step APPNP propagation + head (act -> @W2 + b2 -> log_softmax)
# ---------------------------------------------------------------------------
def _appnp_kernel(a_ref, h_ref, ah_ref, w2_ref, b2_ref, o_ref,
                  za_scr, zb_scr, *, K, tm, n_classes, activation):
    k = pl.program_id(0)                 # propagation step  (outer, "arbitrary")
    i = pl.program_id(1)                 # node-row block    (inner, "arbitrary")
    row0 = pl.multiple_of(i * tm, tm)

    # ---- first grid point only: seed z^(0) = h (already bf16) ----
    @pl.when(jnp.logical_and(k == 0, i == 0))
    def _():
        za_scr[...] = h_ref[...]

    # ---- one APPNP step for this row block:
    #      z^{k+1}[rows] = A_scaled[rows, :] @ z^{k} + (alpha*h)[rows]
    # A_scaled = (1-alpha)*A_hat stored bf16; alpha folded into ah; f32 accumulate.
    # NOTE: with hp = 128 output columns the 2x256^2 MXU (v6e/v7x) runs this matmul
    # at ~50% width; widening hp only pays once A is VMEM-resident (compute-bound).
    a_blk = a_ref[...]                                   # (tm, n_pad) bf16
    ah_rows = ah_ref[pl.ds(row0, tm), :]                 # (tm, hp)    f32

    def prop_step(z_src, z_dst):
        z_new = jnp.dot(a_blk, z_src[...], preferred_element_type=jnp.float32)
        z_dst[pl.ds(row0, tm), :] = (z_new + ah_rows).astype(jnp.bfloat16)

    parity = k % 2

    @pl.when(parity == 0)
    def _():
        prop_step(za_scr, zb_scr)          # even step: A -> B

    @pl.when(parity == 1)
    def _():
        prop_step(zb_scr, za_scr)          # odd step:  B -> A

    # ---- head (last step only): act -> @W2 + b2 -> log_softmax. Output block has a
    # constant index map, so it is copied back to HBM exactly once at grid end.
    @pl.when(k == K - 1)
    def _():
        z_fin = za_scr if (K % 2 == 0) else zb_scr       # z^(K) slot (static)
        zr = _activation(z_fin[pl.ds(row0, tm), :].astype(jnp.float32), activation)
        logits = jnp.dot(zr, w2_ref[...], preferred_element_type=jnp.float32)
        logits = logits + b2_ref[...]
        col = jax.lax.broadcasted_iota(jnp.int32, logits.shape, 1)
        logits = jnp.where(col < n_classes, logits, -1e30)   # mask lane padding
        m = jnp.max(logits, axis=-1, keepdims=True)
        lse = jnp.log(jnp.sum(jnp.exp(logits - m), axis=-1, keepdims=True)) + m
        o_ref[pl.ds(row0, tm), :] = logits - lse


# ---------------------------------------------------------------------------
# Dense GCN-normalized adjacency (PyG gcn_norm w/ add_remaining_self_loops)
# ---------------------------------------------------------------------------
def gcn_norm_dense(edge_index, edge_weight, num_nodes):
    """A[dst, src] layout (message passing out[dst] += w * x[src]).
    Existing self-loop weights are kept; nodes without one get fill value 1."""
    src = edge_index[0]
    dst = edge_index[1]
    if edge_weight is None:
        edge_weight = jnp.ones(src.shape, jnp.float32)
    is_loop = src == dst
    a = jnp.zeros((num_nodes, num_nodes), jnp.float32)
    a = a.at[dst, src].add(jnp.where(is_loop, 0.0, edge_weight))
    loop_w = jnp.zeros((num_nodes,), jnp.float32).at[src].add(
        jnp.where(is_loop, edge_weight, 0.0))
    has_loop = jnp.zeros((num_nodes,), jnp.float32).at[src].add(
        is_loop.astype(jnp.float32)) > 0
    diag = jnp.where(has_loop, loop_w, 1.0)
    idx = jnp.arange(num_nodes)
    a = a.at[idx, idx].set(diag)
    deg = jnp.sum(a, axis=1)
    d_inv_sqrt = jnp.where(deg > 0, jax.lax.rsqrt(deg), 0.0)
    return d_inv_sqrt[:, None] * a * d_inv_sqrt[None, :]


# ---------------------------------------------------------------------------
# VMEM-budget-aware tiling plan (per TPU generation)
# ---------------------------------------------------------------------------
def _vmem_capacity_bytes():
    try:
        return int(pltpu.get_tpu_info().vmem_capacity_bytes)
    except Exception:
        return 64 * 1024 * 1024          # conservative default (v7x per-TC)


def _plan_tiling(n, hp, cp):
    """Return (n_pad, tm, vmem_limit_bytes). tm == n_pad  ==>  A is VMEM-resident."""
    cap = _vmem_capacity_bytes()
    budget = int(cap * 0.80)             # headroom for compiler-internal scratch
    vmem_limit = int(cap * 0.85)

    def footprint(tm, n_pad, a_bufs):
        z_scratch = 2 * n_pad * hp * 2                  # bf16 z ping/pong
        consts = n_pad * hp * 2 + n_pad * hp * 4        # h (bf16) + alpha*h (f32)
        consts += hp * cp * 4 + cp * 4                  # W2 + b2
        out = 2 * n_pad * cp * 4                        # resident output (<=2 bufs)
        a_bytes = a_bufs * tm * n_pad * 2               # bf16 A slab(s)
        return z_scratch + consts + out + a_bytes

    # Resident-A path: one (n_pad, n_pad) bf16 block, DMA'd once, single buffer.
    n128 = _round_up(max(n, 128), 128)
    if footprint(n128, n128, a_bufs=1) <= budget:
        return n128, n128, vmem_limit

    # Streaming path: per-generation row-slab size, double-buffered A.
    tm = 512 if cap >= 96 * 1024 * 1024 else 256
    while tm > 128 and footprint(tm, _round_up(n, tm), a_bufs=2) > budget:
        tm //= 2
    n_pad = _round_up(n, tm)
    return n_pad, tm, vmem_limit


# ---------------------------------------------------------------------------
# Forward wrapper (eval mode: dropout p=0.5 is identity when training=False)
# ---------------------------------------------------------------------------
def model_appnp_forward(x, edge_index, edge_weight, params, K, alpha,
                        activation="relu"):
    assert K >= 1
    n, _ = x.shape
    h_dim = params["w1"].shape[1]
    c = params["w2"].shape[1]

    hp = _round_up(h_dim, 128)
    cp = _round_up(c, 128)
    n_pad, tm, vmem_limit = _plan_tiling(n, hp, cp)
    nb = n_pad // tm

    # --- XLA-side per-graph preprocessing ---
    # Projection hoisted out of the kernel (review): h = act(x @ W1 + b1).
    h = _activation(x @ params["w1"] + params["b1"], activation)          # (n, H) f32
    h_pad = jnp.zeros((n_pad, hp), jnp.float32).at[:n, :h_dim].set(h)
    h_bf = h_pad.astype(jnp.bfloat16)                # seeds z^(0)
    ah = alpha * h_pad                               # teleport term, alpha folded in

    # GCN-normalized adjacency, pre-scaled by (1 - alpha), cast to bf16.
    a_norm = gcn_norm_dense(edge_index, edge_weight, n)
    a_pad = jnp.zeros((n_pad, n_pad), jnp.float32).at[:n, :n].set(
        (1.0 - alpha) * a_norm).astype(jnp.bfloat16)

    w2p = jnp.zeros((hp, cp), jnp.float32).at[:h_dim, :c].set(params["w2"])
    b2p = jnp.zeros((1, cp), jnp.float32).at[0, :c].set(params["b2"])

    kernel = functools.partial(_appnp_kernel, K=int(K), tm=tm,
                               n_classes=c, activation=activation)

    def _call(single_buffer):
        def const_spec(shape):
            kw = {"pipeline_mode": pl.Buffered(1)} if single_buffer else {}
            return pl.BlockSpec(shape, lambda k, i: (0, 0), **kw)

        # A: streamed row slab when nb > 1, single-buffered resident when nb == 1.
        a_kw = ({"pipeline_mode": pl.Buffered(1)}
                if (single_buffer and nb == 1) else {})
        a_spec = pl.BlockSpec((tm, n_pad), lambda k, i: (i, 0), **a_kw)

        return pl.pallas_call(
            kernel,
            out_shape=jax.ShapeDtypeStruct((n_pad, cp), jnp.float32),
            grid_spec=pltpu.PrefetchScalarGridSpec(
                num_scalar_prefetch=0,
                grid=(int(K), nb),
                in_specs=[
                    a_spec,                      # (1-alpha)*A_hat   (bf16)
                    const_spec((n_pad, hp)),     # h                 (bf16, seeds z^0)
                    const_spec((n_pad, hp)),     # alpha*h           (f32 teleport)
                    const_spec((hp, cp)),        # W2                (f32)
                    const_spec((1, cp)),         # b2                (f32)
                ],
                # Resident output: written only at k == K-1, copied out once.
                out_specs=pl.BlockSpec((n_pad, cp), lambda k, i: (0, 0)),
                scratch_shapes=[
                    pltpu.VMEM((n_pad, hp), jnp.bfloat16),   # z ping
                    pltpu.VMEM((n_pad, hp), jnp.bfloat16),   # z pong
                ],
            ),
            compiler_params=pltpu.CompilerParams(
                dimension_semantics=("arbitrary", "arbitrary"),
                vmem_limit_bytes=vmem_limit,
            ),
        )(a_pad, h_bf, ah, w2p, b2p)

    try:
        out_pad = jax.block_until_ready(_call(single_buffer=True))
    except Exception:
        # Fallback for jax versions without BlockSpec(pipeline_mode=...).
        out_pad = jax.block_until_ready(_call(single_buffer=False))

    return out_pad[:n, :c]


# ---------------------------------------------------------------------------
# Pure-JAX reference (mirrors the kernel's bf16-A / bf16-z / f32-accumulate numerics)
# ---------------------------------------------------------------------------
def reference_forward(x, a_norm, params, K, alpha, activation="relu"):
    act = lambda v: _activation(v, activation)
    h = act(x @ params["w1"] + params["b1"])
    a_bf = ((1.0 - alpha) * a_norm).astype(jnp.bfloat16)
    ah = alpha * h
    z = h.astype(jnp.bfloat16)
    for _ in range(K):
        z = (jnp.dot(a_bf, z, preferred_element_type=jnp.float32) + ah
             ).astype(jnp.bfloat16)
    logits = act(z.astype(jnp.float32)) @ params["w2"] + params["b2"]
    return jax.nn.log_softmax(logits, axis=-1)


if __name__ == "__main__":
    # Small synthetic graph: N nodes, F features, H hidden, C classes
    N, F, H, C = 64, 16, 32, 8
    K, alpha = 10, 0.1
    E = 256

    key = jax.random.PRNGKey(0)
    kx, ke, kw, k1, k2, kb1, kb2 = jax.random.split(key, 7)

    x = jax.random.normal(kx, (N, F), dtype=jnp.float32)
    edge_index = jax.random.randint(ke, (2, E), 0, N, dtype=jnp.int32)
    edge_weight = jax.random.uniform(kw, (E,), dtype=jnp.float32)

    params = {
        "w1": jax.random.normal(k1, (F, H), dtype=jnp.float32) / jnp.sqrt(F),
        "b1": jax.random.normal(kb1, (H,), dtype=jnp.float32) * 0.01,
        "w2": jax.random.normal(k2, (H, C), dtype=jnp.float32) / jnp.sqrt(H),
        "b2": jax.random.normal(kb2, (C,), dtype=jnp.float32) * 0.01,
    }

    out = model_appnp_forward(x, edge_index, edge_weight, params, K, alpha)
    out = jax.block_until_ready(out)

    assert out.shape == (N, C)
    # log_softmax rows should exponentiate-sum to 1
    row_sums = jnp.exp(out).sum(axis=-1)
    assert jnp.allclose(row_sums, 1.0, atol=1e-3), row_sums

    # Compare against a pure-JAX reference with matching numerics
    a_norm = gcn_norm_dense(edge_index, edge_weight, N)
    ref = reference_forward(x, a_norm, params, K, alpha)
    assert jnp.allclose(out, ref, atol=2e-2), float(jnp.max(jnp.abs(out - ref)))

    print("KERNEL_OK")
</pallas_src>

<mosaic_0001>
module attributes {stable_mosaic.version = 11 : i64} {
  func.func @_appnp_kernel(%arg0: i32, %arg1: i32, %arg2: memref<128x128xbf16, #tpu.memory_space<vmem>>, %arg3: memref<128x128xbf16, #tpu.memory_space<vmem>>, %arg4: memref<128x128xf32, #tpu.memory_space<vmem>>, %arg5: memref<128x128xf32, #tpu.memory_space<vmem>>, %arg6: memref<1x128xf32, #tpu.memory_space<vmem>>, %arg7: memref<128x128xf32, #tpu.memory_space<vmem>>, %arg8: memref<128x128xbf16, #tpu.memory_space<vmem>>, %arg9: memref<128x128xbf16, #tpu.memory_space<vmem>>) attributes {dimension_semantics = [#tpu.dimension_semantics<arbitrary>, #tpu.dimension_semantics<arbitrary>], iteration_bounds = array<i64: 10, 1>, scalar_prefetch = 0 : i64, scratch_operands = 2 : i64, tpu.core_type = #tpu.core_type<tc>, window_params = [{pipeline_mode = #tpu.pipeline_mode<synchronous>, transform_indices = @transform_0, window_bounds = array<i64: 128, 128>}, {pipeline_mode = #tpu.pipeline_mode<synchronous>, transform_indices = @transform_1, window_bounds = array<i64: 128, 128>}, {pipeline_mode = #tpu.pipeline_mode<synchronous>, transform_indices = @transform_2, window_bounds = array<i64: 128, 128>}, {pipeline_mode = #tpu.pipeline_mode<synchronous>, transform_indices = @transform_3, window_bounds = array<i64: 128, 128>}, {pipeline_mode = #tpu.pipeline_mode<synchronous>, transform_indices = @transform_4, window_bounds = array<i64: 1, 128>}, {pipeline_mode = #tpu.pipeline_mode<synchronous>, transform_indices = @transform_5, window_bounds = array<i64: 128, 128>}]} {
    %c128_i32 = arith.constant 128 : i32
    %0 = arith.muli %arg1, %c128_i32 : i32
    %1 = tpu.assume_multiple %0, 128 : i32
    %c0_i32 = arith.constant 0 : i32
    %2 = arith.cmpi eq, %arg0, %c0_i32 : i32
    %c0_i32_0 = arith.constant 0 : i32
    %3 = arith.cmpi eq, %arg1, %c0_i32_0 : i32
    %4 = arith.andi %2, %3 : i1
    %5 = arith.extui %4 : i1 to i32
    %c0_i32_1 = arith.constant 0 : i32
    %6 = arith.cmpi ne, %5, %c0_i32_1 : i32
    scf.if %6 {
      %c0_13 = arith.constant 0 : index
      %c0_14 = arith.constant 0 : index
      %29 = vector.load %arg3[%c0_13, %c0_14] : memref<128x128xbf16, #tpu.memory_space<vmem>>, vector<128x128xbf16>
      %c0_15 = arith.constant 0 : index
      %c0_16 = arith.constant 0 : index
      %30 = vector.load %arg8[%c0_15, %c0_16] : memref<128x128xbf16, #tpu.memory_space<vmem>>, vector<128x128xbf16>
      tpu.vector_store %arg8[%c0_15, %c0_16], %29 {strides = array<i32>} : memref<128x128xbf16, #tpu.memory_space<vmem>>, vector<128x128xbf16>,
    } else {
    }
    %c0 = arith.constant 0 : index
    %c0_2 = arith.constant 0 : index
    %7 = vector.load %arg2[%c0, %c0_2] : memref<128x128xbf16, #tpu.memory_space<vmem>>, vector<128x128xbf16>
    %8 = arith.index_cast %1 : i32 to index
    %c0_3 = arith.constant 0 : index
    %9 = vector.load %arg4[%8, %c0_3] : memref<128x128xf32, #tpu.memory_space<vmem>>, vector<128x128xf32>
    %c2_i32 = arith.constant 2 : i32
    %c0_i32_4 = arith.constant 0 : i32
    %10 = arith.cmpi eq, %c2_i32, %c0_i32_4 : i32
    %c1_i32 = arith.constant 1 : i32
    %11 = arith.select %10, %c1_i32, %c2_i32 : i32
    %12 = arith.remsi %arg0, %11 : i32
    %c0_i32_5 = arith.constant 0 : i32
    %13 = arith.cmpi ne, %12, %c0_i32_5 : i32
    %c0_i32_6 = arith.constant 0 : i32
    %14 = arith.cmpi slt, %12, %c0_i32_6 : i32
    %c0_i32_7 = arith.constant 0 : i32
    %15 = arith.cmpi slt, %11, %c0_i32_7 : i32
    %16 = arith.xori %14, %15 : i1
    %17 = arith.andi %16, %13 : i1
    %18 = arith.addi %12, %11 : i32
    %19 = arith.select %17, %18, %12 : i32
    %c0_i32_8 = arith.constant 0 : i32
    %20 = arith.cmpi eq, %19, %c0_i32_8 : i32
    %21 = arith.extui %20 : i1 to i32
    %c0_i32_9 = arith.constant 0 : i32
    %22 = arith.cmpi ne, %21, %c0_i32_9 : i32
    scf.if %22 {
      %c0_13 = arith.constant 0 : index
      %c0_14 = arith.constant 0 : index
      %29 = vector.load %arg8[%c0_13, %c0_14] : memref<128x128xbf16, #tpu.memory_space<vmem>>, vector<128x128xbf16>
      %cst = arith.constant dense<0.000000e+00> : vector<128x128xf32>
      %30 = tpu.matmul %7, %29, %cst {dimension_numbers = #tpu.dot_dimension_numbers<[1], [0], [0], [1], [0, 0, 1, 1], [], []>} : vector<128x128xbf16>, vector<128x128xbf16>, vector<128x128xf32> -> vector<128x128xf32>
      %31 = arith.addf %30, %9 : vector<128x128xf32>
      %32 = arith.truncf %31 : vector<128x128xf32> to vector<128x128xbf16>
      %33 = arith.index_cast %1 : i32 to index
      %c0_15 = arith.constant 0 : index
      %34 = vector.load %arg9[%33, %c0_15] : memref<128x128xbf16, #tpu.memory_space<vmem>>, vector<128x128xbf16>
      tpu.vector_store %arg9[%33, %c0_15], %32 {strides = array<i32>} : memref<128x128xbf16, #tpu.memory_space<vmem>>, vector<128x128xbf16>,
    } else {
    }
    %c1_i32_10 = arith.constant 1 : i32
    %23 = arith.cmpi eq, %19, %c1_i32_10 : i32
    %24 = arith.extui %23 : i1 to i32
    %c0_i32_11 = arith.constant 0 : i32
    %25 = arith.cmpi ne, %24, %c0_i32_11 : i32
    scf.if %25 {
      %c0_13 = arith.constant 0 : index
      %c0_14 = arith.constant 0 : index
      %29 = vector.load %arg9[%c0_13, %c0_14] : memref<128x128xbf16, #tpu.memory_space<vmem>>, vector<128x128xbf16>
      %cst = arith.constant dense<0.000000e+00> : vector<128x128xf32>
      %30 = tpu.matmul %7, %29, %cst {dimension_numbers = #tpu.dot_dimension_numbers<[1], [0], [0], [1], [0, 0, 1, 1], [], []>} : vector<128x128xbf16>, vector<128x128xbf16>, vector<128x128xf32> -> vector<128x128xf32>
      %31 = arith.addf %30, %9 : vector<128x128xf32>
      %32 = arith.truncf %31 : vector<128x128xf32> to vector<128x128xbf16>
      %33 = arith.index_cast %1 : i32 to index
      %c0_15 = arith.constant 0 : index
      %34 = vector.load %arg8[%33, %c0_15] : memref<128x128xbf16, #tpu.memory_space<vmem>>, vector<128x128xbf16>
      tpu.vector_store %arg8[%33, %c0_15], %32 {strides = array<i32>} : memref<128x128xbf16, #tpu.memory_space<vmem>>, vector<128x128xbf16>,
    } else {
    }
    %c9_i32 = arith.constant 9 : i32
    %26 = arith.cmpi eq, %arg0, %c9_i32 : i32
    %27 = arith.extui %26 : i1 to i32
    %c0_i32_12 = arith.constant 0 : i32
    %28 = arith.cmpi ne, %27, %c0_i32_12 : i32
    scf.if %28 {
      %29 = arith.index_cast %1 : i32 to index
      %c0_13 = arith.constant 0 : index
      %30 = vector.load %arg8[%29, %c0_13] : memref<128x128xbf16, #tpu.memory_space<vmem>>, vector<128x128xbf16>
      %31 = arith.extf %30 : vector<128x128xbf16> to vector<128x128xf32>
      %cst = arith.constant 0.000000e+00 : f32
      %32 = vector.broadcast %cst : f32 to vector<128x128xf32>
      %33 = arith.maximumf %31, %32 : vector<128x128xf32>
      %c0_14 = arith.constant 0 : index
      %c0_15 = arith.constant 0 : index
      %34 = vector.load %arg5[%c0_14, %c0_15] : memref<128x128xf32, #tpu.memory_space<vmem>>, vector<128x128xf32>
      %cst_16 = arith.constant dense<0.000000e+00> : vector<128x128xf32>
      %35 = tpu.matmul %33, %34, %cst_16 {dimension_numbers = #tpu.dot_dimension_numbers<[1], [0], [0], [1], [0, 0, 1, 1], [], []>} : vector<128x128xf32>, vector<128x128xf32>, vector<128x128xf32> -> vector<128x128xf32>
      %c0_17 = arith.constant 0 : index
      %c0_18 = arith.constant 0 : index
      %36 = vector.load %arg6[%c0_17, %c0_18] : memref<1x128xf32, #tpu.memory_space<vmem>>, vector<1x128xf32>
      %37 = vector.broadcast %36 : vector<1x128xf32> to vector<128x128xf32>
      %38 = arith.addf %35, %37 : vector<128x128xf32>
      %39 = tpu.iota {dimensions = array<i32: 1>} : vector<128x128xi32>
      %c8_i32 = arith.constant 8 : i32
      %40 = vector.broadcast %c8_i32 : i32 to vector<128x128xi32>
      %41 = arith.cmpi slt, %39, %40 : vector<128x128xi32>
      %cst_19 = arith.constant -1.000000e+30 : f32
      %42 = vector.broadcast %cst_19 : f32 to vector<128x128xf32>
      %43 = arith.select %41, %38, %42 : vector<128x128xi1>, vector<128x128xf32>
      %cst_20 = arith.constant dense<0xFF800000> : vector<128xf32>
      %44 = vector.multi_reduction <maximumf>, %43, %cst_20 [1] : vector<128x128xf32> to vector<128xf32>
      %45 = vector.shape_cast %44 : vector<128xf32> to vector<128x1xf32>
      %46 = vector.broadcast %45 : vector<128x1xf32> to vector<128x128xf32>
      %47 = arith.subf %43, %46 : vector<128x128xf32>
      %48 = math.exp %47 : vector<128x128xf32>
      %cst_21 = arith.constant dense<0.000000e+00> : vector<128xf32>
      %49 = vector.multi_reduction <add>, %48, %cst_21 [1] : vector<128x128xf32> to vector<128xf32>
      %50 = vector.shape_cast %49 : vector<128xf32> to vector<128x1xf32>
      %51 = math.log %50 : vector<128x1xf32>
      %52 = arith.addf %51, %45 : vector<128x1xf32>
      %53 = vector.broadcast %52 : vector<128x1xf32> to vector<128x128xf32>
      %54 = arith.subf %43, %53 : vector<128x128xf32>
      %55 = arith.index_cast %1 : i32 to index
      %c0_22 = arith.constant 0 : index
      %56 = vector.load %arg7[%55, %c0_22] : memref<128x128xf32, #tpu.memory_space<vmem>>, vector<128x128xf32>
      tpu.vector_store %arg7[%55, %c0_22], %54 {strides = array<i32>} : memref<128x128xf32, #tpu.memory_space<vmem>>, vector<128x128xf32>,
    } else {
    }
    return
  }
  func.func @transform_0(%arg0: i32, %arg1: i32) -> (i32, i32) {
    %c0_i32 = arith.constant 0 : i32
    %c0_i32_0 = arith.constant 0 : i32
    return %arg1, %c0_i32 : i32, i32
  }
  func.func @transform_1(%arg0: i32, %arg1: i32) -> (i32, i32) {
    %c0_i32 = arith.constant 0 : i32
    %c0_i32_0 = arith.constant 0 : i32
    %c0_i32_1 = arith.constant 0 : i32
    return %c0_i32, %c0_i32_0 : i32, i32
  }
  func.func @transform_2(%arg0: i32, %arg1: i32) -> (i32, i32) {
    %c0_i32 = arith.constant 0 : i32
    %c0_i32_0 = arith.constant 0 : i32
    %c0_i32_1 = arith.constant 0 : i32
    return %c0_i32, %c0_i32_0 : i32, i32
  }
  func.func @transform_3(%arg0: i32, %arg1: i32) -> (i32, i32) {
    %c0_i32 = arith.constant 0 : i32
    %c0_i32_0 = arith.constant 0 : i32
    %c0_i32_1 = arith.constant 0 : i32
    return %c0_i32, %c0_i32_0 : i32, i32
  }
  func.func @transform_4(%arg0: i32, %arg1: i32) -> (i32, i32) {
    %c0_i32 = arith.constant 0 : i32
    %c0_i32_0 = arith.constant 0 : i32
    %c0_i32_1 = arith.constant 0 : i32
    return %c0_i32, %c0_i32_0 : i32, i32
  }
  func.func @transform_5(%arg0: i32, %arg1: i32) -> (i32, i32) {
    %c0_i32 = arith.constant 0 : i32
    %c0_i32_0 = arith.constant 0 : i32
    %c0_i32_1 = arith.constant 0 : i32
    return %c0_i32, %c0_i32_0 : i32, i32
  }
}

module attributes {stable_mosaic.version = 11 : i64} {
  func.func @_appnp_kernel(%arg0: i32, %arg1: i32, %arg2: memref<128x128xbf16, #tpu.memory_space<vmem>>, %arg3: memref<128x128xbf16, #tpu.memory_space<vmem>>, %arg4: memref<128x128xf32, #tpu.memory_space<vmem>>, %arg5: memref<128x128xf32, #tpu.memory_space<vmem>>, %arg6: memref<1x128xf32, #tpu.memory_space<vmem>>, %arg7: memref<128x128xf32, #tpu.memory_space<vmem>>, %arg8: memref<128x128xbf16, #tpu.memory_space<vmem>>, %arg9: memref<128x128xbf16, #tpu.memory_space<vmem>>) attributes {dimension_semantics = [#tpu.dimension_semantics<arbitrary>, #tpu.dimension_semantics<arbitrary>], iteration_bounds = array<i64: 10, 1>, scalar_prefetch = 0 : i64, scratch_operands = 2 : i64, tpu.core_type = #tpu.core_type<tc>, window_params = [{transform_indices = @transform_0, window_bounds = array<i64: 128, 128>}, {pipeline_mode = #tpu.pipeline_mode<synchronous>, transform_indices = @transform_1, window_bounds = array<i64: 128, 128>}, {pipeline_mode = #tpu.pipeline_mode<synchronous>, transform_indices = @transform_2, window_bounds = array<i64: 128, 128>}, {pipeline_mode = #tpu.pipeline_mode<synchronous>, transform_indices = @transform_3, window_bounds = array<i64: 128, 128>}, {pipeline_mode = #tpu.pipeline_mode<synchronous>, transform_indices = @transform_4, window_bounds = array<i64: 1, 128>}, {pipeline_mode = #tpu.pipeline_mode<synchronous>, transform_indices = @transform_5, window_bounds = array<i64: 128, 128>}]} {
    %c128_i32 = arith.constant 128 : i32
    %0 = arith.muli %arg1, %c128_i32 : i32
    %1 = tpu.assume_multiple %0, 128 : i32
    %c0_i32 = arith.constant 0 : i32
    %2 = arith.cmpi eq, %arg0, %c0_i32 : i32
    %c0_i32_0 = arith.constant 0 : i32
    %3 = arith.cmpi eq, %arg1, %c0_i32_0 : i32
    %4 = arith.andi %2, %3 : i1
    %5 = arith.extui %4 : i1 to i32
    %c0_i32_1 = arith.constant 0 : i32
    %6 = arith.cmpi ne, %5, %c0_i32_1 : i32
    scf.if %6 {
      %c0_13 = arith.constant 0 : index
      %c0_14 = arith.constant 0 : index
      %29 = vector.load %arg3[%c0_13, %c0_14] : memref<128x128xbf16, #tpu.memory_space<vmem>>, vector<128x128xbf16>
      %c0_15 = arith.constant 0 : index
      %c0_16 = arith.constant 0 : index
      %30 = vector.load %arg8[%c0_15, %c0_16] : memref<128x128xbf16, #tpu.memory_space<vmem>>, vector<128x128xbf16>
      tpu.vector_store %arg8[%c0_15, %c0_16], %29 {strides = array<i32>} : memref<128x128xbf16, #tpu.memory_space<vmem>>, vector<128x128xbf16>,
    } else {
    }
    %c0 = arith.constant 0 : index
    %c0_2 = arith.constant 0 : index
    %7 = vector.load %arg2[%c0, %c0_2] : memref<128x128xbf16, #tpu.memory_space<vmem>>, vector<128x128xbf16>
    %8 = arith.index_cast %1 : i32 to index
    %c0_3 = arith.constant 0 : index
    %9 = vector.load %arg4[%8, %c0_3] : memref<128x128xf32, #tpu.memory_space<vmem>>, vector<128x128xf32>
    %c2_i32 = arith.constant 2 : i32
    %c0_i32_4 = arith.constant 0 : i32
    %10 = arith.cmpi eq, %c2_i32, %c0_i32_4 : i32
    %c1_i32 = arith.constant 1 : i32
    %11 = arith.select %10, %c1_i32, %c2_i32 : i32
    %12 = arith.remsi %arg0, %11 : i32
    %c0_i32_5 = arith.constant 0 : i32
    %13 = arith.cmpi ne, %12, %c0_i32_5 : i32
    %c0_i32_6 = arith.constant 0 : i32
    %14 = arith.cmpi slt, %12, %c0_i32_6 : i32
    %c0_i32_7 = arith.constant 0 : i32
    %15 = arith.cmpi slt, %11, %c0_i32_7 : i32
    %16 = arith.xori %14, %15 : i1
    %17 = arith.andi %16, %13 : i1
    %18 = arith.addi %12, %11 : i32
    %19 = arith.select %17, %18, %12 : i32
    %c0_i32_8 = arith.constant 0 : i32
    %20 = arith.cmpi eq, %19, %c0_i32_8 : i32
    %21 = arith.extui %20 : i1 to i32
    %c0_i32_9 = arith.constant 0 : i32
    %22 = arith.cmpi ne, %21, %c0_i32_9 : i32
    scf.if %22 {
      %c0_13 = arith.constant 0 : index
      %c0_14 = arith.constant 0 : index
      %29 = vector.load %arg8[%c0_13, %c0_14] : memref<128x128xbf16, #tpu.memory_space<vmem>>, vector<128x128xbf16>
      %cst = arith.constant dense<0.000000e+00> : vector<128x128xf32>
      %30 = tpu.matmul %7, %29, %cst {dimension_numbers = #tpu.dot_dimension_numbers<[1], [0], [0], [1], [0, 0, 1, 1], [], []>} : vector<128x128xbf16>, vector<128x128xbf16>, vector<128x128xf32> -> vector<128x128xf32>
      %31 = arith.addf %30, %9 : vector<128x128xf32>
      %32 = arith.truncf %31 : vector<128x128xf32> to vector<128x128xbf16>
      %33 = arith.index_cast %1 : i32 to index
      %c0_15 = arith.constant 0 : index
      %34 = vector.load %arg9[%33, %c0_15] : memref<128x128xbf16, #tpu.memory_space<vmem>>, vector<128x128xbf16>
      tpu.vector_store %arg9[%33, %c0_15], %32 {strides = array<i32>} : memref<128x128xbf16, #tpu.memory_space<vmem>>, vector<128x128xbf16>,
    } else {
    }
    %c1_i32_10 = arith.constant 1 : i32
    %23 = arith.cmpi eq, %19, %c1_i32_10 : i32
    %24 = arith.extui %23 : i1 to i32
    %c0_i32_11 = arith.constant 0 : i32
    %25 = arith.cmpi ne, %24, %c0_i32_11 : i32
    scf.if %25 {
      %c0_13 = arith.constant 0 : index
      %c0_14 = arith.constant 0 : index
      %29 = vector.load %arg9[%c0_13, %c0_14] : memref<128x128xbf16, #tpu.memory_space<vmem>>, vector<128x128xbf16>
      %cst = arith.constant dense<0.000000e+00> : vector<128x128xf32>
      %30 = tpu.matmul %7, %29, %cst {dimension_numbers = #tpu.dot_dimension_numbers<[1], [0], [0], [1], [0, 0, 1, 1], [], []>} : vector<128x128xbf16>, vector<128x128xbf16>, vector<128x128xf32> -> vector<128x128xf32>
      %31 = arith.addf %30, %9 : vector<128x128xf32>
      %32 = arith.truncf %31 : vector<128x128xf32> to vector<128x128xbf16>
      %33 = arith.index_cast %1 : i32 to index
      %c0_15 = arith.constant 0 : index
      %34 = vector.load %arg8[%33, %c0_15] : memref<128x128xbf16, #tpu.memory_space<vmem>>, vector<128x128xbf16>
      tpu.vector_store %arg8[%33, %c0_15], %32 {strides = array<i32>} : memref<128x128xbf16, #tpu.memory_space<vmem>>, vector<128x128xbf16>,
    } else {
    }
    %c9_i32 = arith.constant 9 : i32
    %26 = arith.cmpi eq, %arg0, %c9_i32 : i32
    %27 = arith.extui %26 : i1 to i32
    %c0_i32_12 = arith.constant 0 : i32
    %28 = arith.cmpi ne, %27, %c0_i32_12 : i32
    scf.if %28 {
      %29 = arith.index_cast %1 : i32 to index
      %c0_13 = arith.constant 0 : index
      %30 = vector.load %arg8[%29, %c0_13] : memref<128x128xbf16, #tpu.memory_space<vmem>>, vector<128x128xbf16>
      %31 = arith.extf %30 : vector<128x128xbf16> to vector<128x128xf32>
      %cst = arith.constant 0.000000e+00 : f32
      %32 = vector.broadcast %cst : f32 to vector<128x128xf32>
      %33 = arith.maximumf %31, %32 : vector<128x128xf32>
      %c0_14 = arith.constant 0 : index
      %c0_15 = arith.constant 0 : index
      %34 = vector.load %arg5[%c0_14, %c0_15] : memref<128x128xf32, #tpu.memory_space<vmem>>, vector<128x128xf32>
      %cst_16 = arith.constant dense<0.000000e+00> : vector<128x128xf32>
      %35 = tpu.matmul %33, %34, %cst_16 {dimension_numbers = #tpu.dot_dimension_numbers<[1], [0], [0], [1], [0, 0, 1, 1], [], []>} : vector<128x128xf32>, vector<128x128xf32>, vector<128x128xf32> -> vector<128x128xf32>
      %c0_17 = arith.constant 0 : index
      %c0_18 = arith.constant 0 : index
      %36 = vector.load %arg6[%c0_17, %c0_18] : memref<1x128xf32, #tpu.memory_space<vmem>>, vector<1x128xf32>
      %37 = vector.broadcast %36 : vector<1x128xf32> to vector<128x128xf32>
      %38 = arith.addf %35, %37 : vector<128x128xf32>
      %39 = tpu.iota {dimensions = array<i32: 1>} : vector<128x128xi32>
      %c8_i32 = arith.constant 8 : i32
      %40 = vector.broadcast %c8_i32 : i32 to vector<128x128xi32>
      %41 = arith.cmpi slt, %39, %40 : vector<128x128xi32>
      %cst_19 = arith.constant -1.000000e+30 : f32
      %42 = vector.broadcast %cst_19 : f32 to vector<128x128xf32>
      %43 = arith.select %41, %38, %42 : vector<128x128xi1>, vector<128x128xf32>
      %cst_20 = arith.constant dense<0xFF800000> : vector<128xf32>
      %44 = vector.multi_reduction <maximumf>, %43, %cst_20 [1] : vector<128x128xf32> to vector<128xf32>
      %45 = vector.shape_cast %44 : vector<128xf32> to vector<128x1xf32>
      %46 = vector.broadcast %45 : vector<128x1xf32> to vector<128x128xf32>
      %47 = arith.subf %43, %46 : vector<128x128xf32>
      %48 = math.exp %47 : vector<128x128xf32>
      %cst_21 = arith.constant dense<0.000000e+00> : vector<128xf32>
      %49 = vector.multi_reduction <add>, %48, %cst_21 [1] : vector<128x128xf32> to vector<128xf32>
      %50 = vector.shape_cast %49 : vector<128xf32> to vector<128x1xf32>
      %51 = math.log %50 : vector<128x1xf32>
      %52 = arith.addf %51, %45 : vector<128x1xf32>
      %53 = vector.broadcast %52 : vector<128x1xf32> to vector<128x128xf32>
      %54 = arith.subf %43, %53 : vector<128x128xf32>
      %55 = arith.index_cast %1 : i32 to index
      %c0_22 = arith.constant 0 : index
      %56 = vector.load %arg7[%55, %c0_22] : memref<128x128xf32, #tpu.memory_space<vmem>>, vector<128x128xf32>
      tpu.vector_store %arg7[%55, %c0_22], %54 {strides = array<i32>} : memref<128x128xf32, #tpu.memory_space<vmem>>, vector<128x128xf32>,
    } else {
    }
    return
  }
  func.func @transform_0(%arg0: i32, %arg1: i32) -> (i32, i32) {
    %c0_i32 = arith.constant 0 : i32
    %c0_i32_0 = arith.constant 0 : i32
    return %arg1, %c0_i32 : i32, i32
  }
  func.func @transform_1(%arg0: i32, %arg1: i32) -> (i32, i32) {
    %c0_i32 = arith.constant 0 : i32
    %c0_i32_0 = arith.constant 0 : i32
    %c0_i32_1 = arith.constant 0 : i32
    return %c0_i32, %c0_i32_0 : i32, i32
  }
  func.func @transform_2(%arg0: i32, %arg1: i32) -> (i32, i32) {
    %c0_i32 = arith.constant 0 : i32
    %c0_i32_0 = arith.constant 0 : i32
    %c0_i32_1 = arith.constant 0 : i32
    return %c0_i32, %c0_i32_0 : i32, i32
  }
  func.func @transform_3(%arg0: i32, %arg1: i32) -> (i32, i32) {
    %c0_i32 = arith.constant 0 : i32
    %c0_i32_0 = arith.constant 0 : i32
    %c0_i32_1 = arith.constant 0 : i32
    return %c0_i32, %c0_i32_0 : i32, i32
  }
  func.func @transform_4(%arg0: i32, %arg1: i32) -> (i32, i32) {
    %c0_i32 = arith.constant 0 : i32
    %c0_i32_0 = arith.constant 0 : i32
    %c0_i32_1 = arith.constant 0 : i32
    return %c0_i32, %c0_i32_0 : i32, i32
  }
  func.func @transform_5(%arg0: i32, %arg1: i32) -> (i32, i32) {
    %c0_i32 = arith.constant 0 : i32
    %c0_i32_0 = arith.constant 0 : i32
    %c0_i32_1 = arith.constant 0 : i32
    return %c0_i32, %c0_i32_0 : i32, i32
  }
}

</mosaic_0001>

<bundles_post_ra>
// kernel: tpu_custom_call.1
= control target key start
LH: loop header
LB: loop body
LE: loop exit
PB: predicated region body
PF: predicated region fallthrough
CT: control target
= control target key end

     0   :  { %10 = vsyncpa [#allocation5], 0  ;;  %s2792_s0 = inlined_call_operand.hbm [shape: bf16[128,128], index: 0, kind: input, shape index: {}]   ;;  %s2793_s1 = inlined_call_operand.hbm [shape: bf16[128,128], index: 1, kind: input, shape index: {}]   ;;  %s2794_s2 = inlined_call_operand.hbm [shape: f32[128,128], index: 2, kind: input, shape index: {}]   ;;  %s2795_s3 = inlined_call_operand.hbm [shape: f32[128,128], index: 3, kind: input, shape index: {}]   ;;  %s2796_s4 = inlined_call_operand.vmem [shape: f32[1,128], index: 4, kind: input, shape index: {}]   ;;  %s2797_s5 = inlined_call_operand.hbm [shape: f32[128,128], index: 5, kind: output, shape index: {}]  }
   0x1   :  { %11 = vsyncpa [#allocation8], 0 }
   0x2   :  { %12 = vsyncpa [#allocation11], 0 }
   0x3   :  { %13 = vsyncpa [#allocation6], 0  ;;  %s2352_s18 = smov 0   ;;  %s2354_s19 = smov 0  }
   0x4   :  { %s2356_s20 = smov 0  }
   0x5 LB: > { %s1484_s21 = sadd.s32 4294967295, %s2309_s20   ;;  %p1485_p0 = scmp.ge.s32.totalorder %s2309_s20, 1  ;;  %s2309_s20 = sphi %s2356_s20, %s19_s20   ;;  %s2305_s19 = sphi %s2354_s19, %s2804_s19   ;;  %s2301_s18 = sphi %s2352_s18, %s2803_s18  }
   0x6   : > { %p167_p1 = scmp.lt.s32.totalorder %s2309_s20, 11  ;;  %p2372_p2 = scmp.eq.s32.totalorder %s1484_s21, 0 }
   0x7   : > { %s2311_s24 = smov [#allocation7]   ;;  %s31_s27 = sadd.s32 1, %s2305_s19 }
   0x8   : > { %p2376_p3 = pnand %p1485_p0, %p167_p1  ;;  %s195_s25 = sshll.u32 %s2311_s24, 4  ;;  %s196_s25 = int_to_ptr.vmem [resolvable:$true] %s195_s25 }
   0x9   : > { %p2389_p6 = scmp.ge.s32.totalorder %s31_s27, 10  ;;  %s2312_s29 = smov [#allocation4]  }
   0xa   : > { %p2005_p4 = pneg %p2376_p3  ;;  %s182_s30 = sshll.u32 %s2312_s29, 4  ;;  %s183_s30 = int_to_ptr.vmem [resolvable:$true] %s182_s30 }
   0xb   : > { %s2154_s6 = scalar_lea.vmem %s196_s25, 1024  ;;  %p2162_p11 = scmp.lt.s32.totalorder %s196_s25, %s196_s25 }
   0xc   : > { %p2384_p5 = pnand %p2372_p2, %p2005_p4  ;;  %p2155_p8 = scmp.ne.s32.totalorder %s196_s25, %s2154_s6 }
   0xd   : > { %p2163_p12 = scmp.lt.s32.totalorder %s2154_s6, %s2154_s6 }
   0xe   : > { %p2145_p7 = pneg %p2384_p5 }
   0xf   : > { %p2164_p13 = por %p2163_p12, %p2162_p11 }
  0x10   : > { %p2157_p9 = pnand %p2155_p8, %p2145_p7 }
  0x12   : > { %p2158_p10 = pneg %p2157_p9 }
  0x14   : > { %p2165_p0 = pnand %p2164_p13, %p2158_p10 }
  0x16   : > { %2168 = shalt.err (!%p2165_p0)
}
  0x17   : > { %s2313_s7 = smov 64   ;;  %s2314_s8 = smov 4  }
  0x18   : > { %2011 = dma.hbm_to_vmem [thread:$0]  (!%p2384_p5), %s2793_s1, 1024, %s196_s25, [#allocation8], %s2313_s7, %s2313_s7, %s2314_s8  }
  0x19   : > { %s2806_s27 = smov (%p2389_p6, %s31_s27), 0  ;;  %s2180_s11 = scalar_lea.vmem %s183_s30, 1024 }
  0x1a   : > { %p2181_p1 = scmp.ne.s32.totalorder %s183_s30, %s2180_s11  ;;  %p2188_p9 = scmp.lt.s32.totalorder %s183_s30, %s183_s30 }
  0x1b   : > { %p2189_p10 = scmp.lt.s32.totalorder %s2180_s11, %s2180_s11 }
  0x1c   : > { %p2183_p4 = pnand %p2181_p1, %p2145_p7 }
  0x1d   : > { %p2190_p11 = por %p2189_p10, %p2188_p9 }
  0x1e   : > { %p2184_p8 = pneg %p2183_p4 }
  0x20   : > { %p2191_p12 = pnand %p2190_p11, %p2184_p8 }
  0x22   : > { %2194 = shalt.err (!%p2191_p12)
}
  0x23   : > { %2008 = dma.hbm_to_vmem [thread:$0]  (!%p2384_p5), %s2792_s0, 1024, %s183_s30, [#allocation5], %s2313_s7, %s2313_s7, %s2314_s8  }
  0x24   : > { %s2315_s14 = smov [#allocation9]  }
  0x25   : > { %s208_s15 = sshll.u32 %s2315_s14, 4  ;;  %s209_s15 = int_to_ptr.vmem [resolvable:$true] %s208_s15 }
  0x26   : > { %s2206_s16 = scalar_lea.vmem %s209_s15, 2048  ;;  %p2214_p1 = scmp.lt.s32.totalorder %s209_s15, %s209_s15 }
  0x27   : > { %p2207_p6 = scmp.ne.s32.totalorder %s209_s15, %s2206_s16  ;;  %p2215_p4 = scmp.lt.s32.totalorder %s2206_s16, %s2206_s16 }
  0x29   : > { %p2209_p13 = pnand %p2207_p6, %p2145_p7  ;;  %p2216_p8 = por %p2215_p4, %p2214_p1 }
  0x2b   : > { %p2210_p0 = pneg %p2209_p13 }
  0x2d   : > { %p2217_p9 = pnand %p2216_p8, %p2210_p0 }
  0x2f   : > { %2220 = shalt.err (!%p2217_p9)
}
  0x30   : > { %s2316_s17 = smov 128   ;;  %s2317_s24 = smov 8  }
  0x31   : > { %2014 = dma.hbm_to_vmem [thread:$0]  (!%p2384_p5), %s2794_s2, 2048, %s209_s15, [#allocation8], %s2316_s17, %s2316_s17, %s2317_s24  }
  0x32   : > { %s2318_s29 = smov [#allocation10]  }
  0x33   : > { %s221_s30 = sshll.u32 %s2318_s29, 4  ;;  %s222_s30 = int_to_ptr.vmem [resolvable:$true] %s221_s30 }
  0x34   : > { %s2232_s6 = scalar_lea.vmem %s222_s30, 2048  ;;  %p2240_p6 = scmp.lt.s32.totalorder %s222_s30, %s222_s30 }
  0x35   : > { %p2233_p10 = scmp.ne.s32.totalorder %s222_s30, %s2232_s6  ;;  %p2241_p13 = scmp.lt.s32.totalorder %s2232_s6, %s2232_s6 }
  0x37   : > { %p2235_p11 = pnand %p2233_p10, %p2145_p7  ;;  %p2242_p0 = por %p2241_p13, %p2240_p6 }
  0x39   : > { %p2236_p12 = pneg %p2235_p11 }
  0x3b   : > { %p2243_p1 = pnand %p2242_p0, %p2236_p12 }
  0x3d   : > { %2246 = shalt.err (!%p2243_p1)
}
  0x3e   : > { %2017 = dma.hbm_to_vmem [thread:$0]  (!%p2384_p5), %s2795_s3, 2048, %s222_s30, [#allocation11], %s2316_s17, %s2316_s17, %s2317_s24  }
  0x3f   : > { %240 = sbr.rel (%p2376_p3) target bundleno = 1198 (0x4ae), region = 40 }
  0x44   : > { %2284 = dma.done.wait (%p2372_p2), [#allocation5], 1024  }
  0x45   : > { %2286 = vsyncadd (%p2372_p2), [#allocation5], 4294966272 }
  0x46   : > { %2288 = dma.done.wait (%p2372_p2), [#allocation8], 3072  }
  0x47   : > { %2290 = vsyncadd (%p2372_p2), [#allocation8], 4294964224 }
  0x48   : > { %2292 = dma.done.wait (%p2372_p2), [#allocation11], 2048  }
  0x49   : > { %2294 = vsyncadd (%p2372_p2), [#allocation11], 4294965248  ;;  %p273_p3 = scmp.eq.s32.totalorder %s2301_s18, 0 }
  0x4a   : > { %v279_v0 = vld [vmem:[#allocation7] sm:$0xff] (%p273_p3)   ;;  %v281_v1 = vld [vmem:[#allocation7 + $0x8] sm:$0xff] (%p273_p3)   ;;  %v283_v2 = vld [vmem:[#allocation7 + $0x10] sm:$0xff] (%p273_p3)  }
  0x4b   : > { %278 = sbr.rel (!%p273_p3) target bundleno = 80 (0x50), region = 60  ;;  %295 = vst [vmem:[#allocation2] sm:$0xff] (%p273_p3), %v279_v0   ;;  %297 = vst [vmem:[#allocation2 + $0x8] sm:$0xff] (%p273_p3), %v281_v1   ;;  %v285_v3 = vld [vmem:[#allocation7 + $0x18] sm:$0xff] (%p273_p3)   ;;  %v287_v4 = vld [vmem:[#allocation7 + $0x20] sm:$0xff] (%p273_p3)  }
  0x4c   : > { %299 = vst [vmem:[#allocation2 + $0x10] sm:$0xff] (%p273_p3), %v283_v2   ;;  %v289_v5 = vld [vmem:[#allocation7 + $0x28] sm:$0xff] (%p273_p3)   ;;  %301 = vst [vmem:[#allocation2 + $0x18] sm:$0xff] (%p273_p3), %v285_v3   ;;  %v291_v6 = vld [vmem:[#allocation7 + $0x30] sm:$0xff] (%p273_p3)  }
  0x4d   : > { %303 = vst [vmem:[#allocation2 + $0x20] sm:$0xff] (%p273_p3), %v287_v4   ;;  %305 = vst [vmem:[#allocation2 + $0x28] sm:$0xff] (%p273_p3), %v289_v5   ;;  %v293_v7 = vld [vmem:[#allocation7 + $0x38] sm:$0xff] (%p273_p3)  }
  0x4e   : > { %307 = vst [vmem:[#allocation2 + $0x30] sm:$0xff] (%p273_p3), %v291_v6   ;;  %309 = vst [vmem:[#allocation2 + $0x38] sm:$0xff] (%p273_p3), %v293_v7  }
  0x50 PF: > { %v2446_v8 = vld [vmem:[#allocation4] sm:$0xf]  ;;  %v2448_v9 = vld [vmem:[#allocation4 + $0x4] sm:$0xf]  ;;  %v2450_v10 = vld [vmem:[#allocation4 + $0x8] sm:$0xf] }
  0x51   : > { %v2452_v11 = vld [vmem:[#allocation4 + $0xc] sm:$0xf]  ;;  %v2454_v12 = vld [vmem:[#allocation4 + $0x10] sm:$0xf]  ;;  %v2456_v13 = vld [vmem:[#allocation4 + $0x14] sm:$0xf] }
  0x52   : > { %v2458_v14 = vld [vmem:[#allocation4 + $0x18] sm:$0xf]  ;;  %v2460_v15 = vld [vmem:[#allocation4 + $0x1c] sm:$0xf]  ;;  %v2462_v16 = vld [vmem:[#allocation4 + $0x20] sm:$0xf] }
  0x53   : > { %v2464_v17 = vld [vmem:[#allocation4 + $0x24] sm:$0xf]  ;;  %v2466_v18 = vld [vmem:[#allocation4 + $0x28] sm:$0xf]  ;;  %v2468_v19 = vld [vmem:[#allocation4 + $0x2c] sm:$0xf] }
  0x54   : > { %v2470_v20 = vld [vmem:[#allocation4 + $0x30] sm:$0xf]  ;;  %v2472_v21 = vld [vmem:[#allocation4 + $0x34] sm:$0xf]  ;;  %v2474_v22 = vld [vmem:[#allocation4 + $0x38] sm:$0xf] }
  0x55   : > { %v2476_v23 = vld [vmem:[#allocation4 + $0x3c] sm:$0xf]  ;;  %v2478_v24 = vld [vmem:[#allocation9] sm:$0xff]  ;;  %v2480_v25 = vld [vmem:[#allocation9 + $0x8] sm:$0xff]  ;;  %p344_p2 = scmp.lt.s32.totalorder %s2301_s18, 0  ;;  %s345_s22 = ssub.s32 0, %s2301_s18 }
  0x56   : > { %v2484_v26 = vld [vmem:[#allocation9 + $0x10] sm:$0xff]  ;;  %v2486_v27 = vld [vmem:[#allocation9 + $0x18] sm:$0xff]  ;;  %v2488_v28 = vld [vmem:[#allocation9 + $0x20] sm:$0xff]  ;;  %s1496_s23 = smin.u32 %s2301_s18, %s345_s22 }
  0x57   : > { %v2491_v29 = vld [vmem:[#allocation9 + $0x28] sm:$0xff]  ;;  %v2493_v30 = vld [vmem:[#allocation9 + $0x30] sm:$0xff]  ;;  %v2495_v31 = vld [vmem:[#allocation9 + $0x38] sm:$0xff]  ;;  %s347_s26 = sand.u32 1, %s1496_s23  }
  0x58   : > { %v2497_v32 = vld [vmem:[#allocation9 + $0x40] sm:$0xff]  ;;  %v2499_v33 = vld [vmem:[#allocation9 + $0x48] sm:$0xff]  ;;  %v2501_v34 = vld [vmem:[#allocation9 + $0x50] sm:$0xff]  ;;  %s348_s9 = ssub.s32 0, %s347_s26 }
  0x59   : > { %v2503_v35 = vld [vmem:[#allocation9 + $0x58] sm:$0xff]  ;;  %v2505_v36 = vld [vmem:[#allocation9 + $0x60] sm:$0xff]  ;;  %v2507_v37 = vld [vmem:[#allocation9 + $0x68] sm:$0xff]  ;;  %s2808_s9 = smov (!%p344_p2, %s348_s9), %s347_s26 }
  0x5a   : > { %v2511_v38 = vld [vmem:[#allocation9 + $0x70] sm:$0xff]  ;;  %v2513_v39 = vld [vmem:[#allocation9 + $0x78] sm:$0xff]  ;;  %p1498_p5 = scmp.lt.s32.totalorder %s2808_s9, 0  ;;  %s354_s10 = sadd.s32 2, %s2808_s9 }
  0x5c   : > { %s2810_s10 = smov (!%p1498_p5, %s354_s10), %s2808_s9 }
  0x5d   : > { %p1499_p7 = scmp.ne.s32.totalorder %s2810_s10, 0 }
  0x5f   : > { %359 = sbr.rel (%p1499_p7) target bundleno = 345 (0x159), region = 64 }
  0x64   : > { %v2063_v40 = vld [vmem:[#allocation2 + $0x38] sm:$0xff]   ;;  %v2064_v41 = vld [vmem:[#allocation2 + $0x30] sm:$0xff]   ;;  %v1500_v42 = vcombine.low %v2446_v8, %v2448_v9  ;;  %v1504_v43 = vcombine.low %v2462_v16, %v2464_v17  ;;  %v2065_v44 = vld [vmem:[#allocation2 + $0x28] sm:$0xff]   ;;  %v1501_v50 = vcombine.low %v2450_v10, %v2452_v11  ;;  %v1505_v51 = vcombine.low %v2466_v18, %v2468_v19 }
  0x65   : > { %1801 = vmatprep.subr.bf16.mxu0 %v2063_v40  ;;  %1921 = vmatprep.subr.bf16.mxu1 %v2063_v40  ;;  %v2066_v45 = vld [vmem:[#allocation2 + $0x20] sm:$0xff]   ;;  %v2067_v46 = vld [vmem:[#allocation2 + $0x18] sm:$0xff]   ;;  %v2068_v47 = vld [vmem:[#allocation2 + $0x10] sm:$0xff]   ;;  %v1502_v52 = vcombine.low %v2454_v12, %v2456_v13  ;;  %v1506_v53 = vcombine.low %v2470_v20, %v2472_v21  ;;  %v1503_v54 = vcombine.low %v2458_v14, %v2460_v15 }
  0x66   : > { %1802 = vmatpush3.bf16.msra.mxu0 %v2063_v40  ;;  %1929 = vmatpush3.bf16.msra.mxu1 %v2063_v40  ;;  %v2069_v48 = vld [vmem:[#allocation2 + $0x8] sm:$0xff]   ;;  %v2070_v49 = vld [vmem:[#allocation2] sm:$0xff]   ;;  %v1507_v55 = vcombine.low %v2474_v22, %v2476_v23 }
  0x67   : > { %1803 = vmatprep.subr.bf16.mxu0 %v2064_v41  ;;  %1922 = vmatprep.subr.bf16.mxu1 %v2064_v41 }
  0x68   : > { %1817 = vmatprep.mubr.bf16.mxu0 %v1500_v42  ;;  %1825 = vmatprep.mubr.bf16.mxu1 %v1504_v43 }
  0x6a   : > { %1804 = vmatpush3.bf16.msra.mxu0 %v2064_v41  ;;  %1930 = vmatpush3.bf16.msra.mxu1 %v2064_v41 }
  0x6b   : > { %1805 = vmatprep.subr.bf16.mxu0 %v2065_v44  ;;  %1923 = vmatprep.subr.bf16.mxu1 %v2065_v44 }
  0x6e   : > { %1806 = vmatpush3.bf16.msra.mxu0 %v2065_v44  ;;  %1931 = vmatpush3.bf16.msra.mxu1 %v2065_v44 }
  0x6f   : > { %1807 = vmatprep.subr.bf16.mxu0 %v2066_v45  ;;  %1924 = vmatprep.subr.bf16.mxu1 %v2066_v45 }
  0x72   : > { %1808 = vmatpush3.bf16.msra.mxu0 %v2066_v45  ;;  %1932 = vmatpush3.bf16.msra.mxu1 %v2066_v45 }
  0x73   : > { %1809 = vmatprep.subr.bf16.mxu0 %v2067_v46  ;;  %1925 = vmatprep.subr.bf16.mxu1 %v2067_v46 }
  0x76   : > { %1810 = vmatpush3.bf16.msra.mxu0 %v2067_v46  ;;  %1933 = vmatpush3.bf16.msra.mxu1 %v2067_v46 }
  0x77   : > { %1811 = vmatprep.subr.bf16.mxu0 %v2068_v47  ;;  %1926 = vmatprep.subr.bf16.mxu1 %v2068_v47 }
  0x7a   : > { %1812 = vmatpush3.bf16.msra.mxu0 %v2068_v47  ;;  %1934 = vmatpush3.bf16.msra.mxu1 %v2068_v47 }
  0x7b   : > { %1813 = vmatprep.subr.bf16.mxu0 %v2069_v48  ;;  %1927 = vmatprep.subr.bf16.mxu1 %v2069_v48 }
  0x7e   : > { %1814 = vmatpush3.bf16.msra.mxu0 %v2069_v48  ;;  %1935 = vmatpush3.bf16.msra.mxu1 %v2069_v48 }
  0x7f   : > { %1815 = vmatprep.subr.bf16.mxu0 %v2070_v49  ;;  %1928 = vmatprep.subr.bf16.mxu1 %v2070_v49 }
  0x82   : > { %1816 = vmatpush3.bf16.msra.mxu0 %v2070_v49  ;;  %1936 = vmatpush3.bf16.msra.mxu1 %v2070_v49 }
  0x85   : > { %1818 = vmatmul.mubr.bf16.vlgmr.msra.gmra.mxu0 %v1501_v50  ;;  %1826 = vmatmul.mubr.bf16.vlgmr.msra.gmra.mxu1 %v1505_v51 }
  0x86   : > { %1821 = vmatprep.mubr.bf16.mxu0 %v1502_v52  ;;  %1829 = vmatprep.mubr.bf16.mxu1 %v1506_v53 }
  0x8d   : > { %1822 = vmatmul.mubr.bf16.gmra.mxu0 %v1503_v54  ;;  %1830 = vmatmul.mubr.bf16.gmra.mxu1 %v1507_v55 }
 0x145   : > { %v1819_v56 = vpop.f32.mrf.mxu0  ;;  %v1827_v57 = vpop.f32.mrf.mxu1 }
 0x146   : > { %v515_v62 = vadd.f32 %v1819_v56, %v2484_v26  ;;  %v547_v63 = vadd.f32 %v1827_v57, %v2501_v34 }
 0x147   : > { %v506_v58 = vpop.f32.mrf.mxu0  ;;  %v538_v59 = vpop.f32.mrf.mxu1 }
 0x148   : > { %v507_v2 = vadd.f32 %v506_v58, %v2478_v24  ;;  %v539_v3 = vadd.f32 %v538_v59, %v2497_v32 }
 0x149   : > { %v1820_v60 = vpop.f32.mrf.mxu0  ;;  %v1828_v61 = vpop.f32.mrf.mxu1 }
 0x14a   : > { %v518_v0 = vadd.f32 %v1820_v60, %v2486_v27  ;;  %v550_v1 = vadd.f32 %v1828_v61, %v2503_v35 }
 0x14b   : > { %v509_v4 = vpop.f32.mrf.mxu0  ;;  %v541_v5 = vpop.f32.mrf.mxu1 }
 0x14c   : > { %v1612_v6 = vpack.c.bf16 %v518_v0, %v515_v62  ;;  %v1632_v7 = vpack.c.bf16 %v550_v1, %v547_v63  ;;  %v510_v40 = vadd.f32 %v509_v4, %v2480_v25  ;;  %v542_v41 = vadd.f32 %v541_v5, %v2499_v33 }
 0x14d   : > { %v1823_v42 = vpop.f32.mrf.mxu0  ;;  %v1831_v43 = vpop.f32.mrf.mxu1 }
 0x14e   : > { %1716 = vst [vmem:[#allocation3 + $0x8] sm:$0xff] %v1612_v6   ;;  %1720 = vst [vmem:[#allocation3 + $0x28] sm:$0xff] %v1632_v7   ;;  %v1607_v44 = vpack.c.bf16 %v510_v40, %v507_v2  ;;  %v1627_v45 = vpack.c.bf16 %v542_v41, %v539_v3  ;;  %v531_v50 = vadd.f32 %v1823_v42, %v2493_v30 }
 0x14f   : > { %v522_v46 = vpop.f32.mrf.mxu0  ;;  %v554_v47 = vpop.f32.mrf.mxu1  ;;  %v563_v51 = vadd.f32 %v1831_v43, %v2511_v38 }
 0x150   : > { %1608 = vst [vmem:[#allocation3] sm:$0xff] %v1607_v44   ;;  %1719 = vst [vmem:[#allocation3 + $0x20] sm:$0xff] %v1627_v45   ;;  %v523_v54 = vadd.f32 %v522_v46, %v2488_v28  ;;  %v555_v55 = vadd.f32 %v554_v47, %v2505_v36 }
 0x151   : > { %v1824_v48 = vpop.f32.mrf.mxu0  ;;  %v1832_v49 = vpop.f32.mrf.mxu1 }
 0x152   : > { %v534_v52 = vadd.f32 %v1824_v48, %v2495_v31  ;;  %v566_v53 = vadd.f32 %v1832_v49, %v2513_v39 }
 0x153   : > { %v525_v56 = vpop.f32.mrf.mxu0  ;;  %v557_v57 = vpop.f32.mrf.mxu1 }
 0x154   : > { %v1622_v58 = vpack.c.bf16 %v534_v52, %v531_v50  ;;  %v1642_v59 = vpack.c.bf16 %v566_v53, %v563_v51  ;;  %v526_v60 = vadd.f32 %v525_v56, %v2491_v29  ;;  %v558_v61 = vadd.f32 %v557_v57, %v2507_v37 }
 0x156   : > { %1718 = vst [vmem:[#allocation3 + $0x18] sm:$0xff] %v1622_v58   ;;  %1722 = vst [vmem:[#allocation3 + $0x38] sm:$0xff] %v1642_v59   ;;  %v1617_v62 = vpack.c.bf16 %v526_v60, %v523_v54  ;;  %v1637_v63 = vpack.c.bf16 %v558_v61, %v555_v55 }
 0x158   : > { %1717 = vst [vmem:[#allocation3 + $0x10] sm:$0xff] %v1617_v62   ;;  %1721 = vst [vmem:[#allocation3 + $0x30] sm:$0xff] %v1637_v63  }
 0x159 PF: > { %p1532_p4 = scmp.ne.s32.totalorder %s2810_s10, 1 }
 0x15b   : > { %656 = sbr.rel (%p1532_p4) target bundleno = 597 (0x255), region = 68 }
 0x160   : > { %v2071_v0 = vld [vmem:[#allocation3 + $0x38] sm:$0xff]   ;;  %v2072_v1 = vld [vmem:[#allocation3 + $0x30] sm:$0xff]   ;;  %v1533_v2 = vcombine.low %v2446_v8, %v2448_v9  ;;  %v1537_v3 = vcombine.low %v2462_v16, %v2464_v17  ;;  %v2073_v4 = vld [vmem:[#allocation3 + $0x28] sm:$0xff]   ;;  %v1534_v6 = vcombine.low %v2450_v10, %v2452_v11  ;;  %v1538_v7 = vcombine.low %v2466_v18, %v2468_v19 }
 0x161   : > { %1833 = vmatprep.subr.bf16.mxu0 %v2071_v0  ;;  %1937 = vmatprep.subr.bf16.mxu1 %v2071_v0  ;;  %v2074_v5 = vld [vmem:[#allocation3 + $0x20] sm:$0xff]   ;;  %v2075_v8 = vld [vmem:[#allocation3 + $0x18] sm:$0xff]   ;;  %v2076_v9 = vld [vmem:[#allocation3 + $0x10] sm:$0xff]   ;;  %v1535_v40 = vcombine.low %v2454_v12, %v2456_v13  ;;  %v1539_v41 = vcombine.low %v2470_v20, %v2472_v21  ;;  %v1536_v42 = vcombine.low %v2458_v14, %v2460_v15 }
 0x162   : > { %1834 = vmatpush3.bf16.msra.mxu0 %v2071_v0  ;;  %1945 = vmatpush3.bf16.msra.mxu1 %v2071_v0  ;;  %v2077_v16 = vld [vmem:[#allocation3 + $0x8] sm:$0xff]   ;;  %v2078_v17 = vld [vmem:[#allocation3] sm:$0xff]   ;;  %v1540_v10 = vcombine.low %v2474_v22, %v2476_v23 }
 0x163   : > { %1835 = vmatprep.subr.bf16.mxu0 %v2072_v1  ;;  %1938 = vmatprep.subr.bf16.mxu1 %v2072_v1 }
 0x164   : > { %1849 = vmatprep.mubr.bf16.mxu0 %v1533_v2  ;;  %1857 = vmatprep.mubr.bf16.mxu1 %v1537_v3 }
 0x166   : > { %1836 = vmatpush3.bf16.msra.mxu0 %v2072_v1  ;;  %1946 = vmatpush3.bf16.msra.mxu1 %v2072_v1 }
 0x167   : > { %1837 = vmatprep.subr.bf16.mxu0 %v2073_v4  ;;  %1939 = vmatprep.subr.bf16.mxu1 %v2073_v4 }
 0x16a   : > { %1838 = vmatpush3.bf16.msra.mxu0 %v2073_v4  ;;  %1947 = vmatpush3.bf16.msra.mxu1 %v2073_v4 }
 0x16b   : > { %1839 = vmatprep.subr.bf16.mxu0 %v2074_v5  ;;  %1940 = vmatprep.subr.bf16.mxu1 %v2074_v5 }
 0x16e   : > { %1840 = vmatpush3.bf16.msra.mxu0 %v2074_v5  ;;  %1948 = vmatpush3.bf16.msra.mxu1 %v2074_v5 }
 0x16f   : > { %1841 = vmatprep.subr.bf16.mxu0 %v2075_v8  ;;  %1941 = vmatprep.subr.bf16.mxu1 %v2075_v8 }
 0x172   : > { %1842 = vmatpush3.bf16.msra.mxu0 %v2075_v8  ;;  %1949 = vmatpush3.bf16.msra.mxu1 %v2075_v8 }
 0x173   : > { %1843 = vmatprep.subr.bf16.mxu0 %v2076_v9  ;;  %1942 = vmatprep.subr.bf16.mxu1 %v2076_v9 }
 0x176   : > { %1844 = vmatpush3.bf16.msra.mxu0 %v2076_v9  ;;  %1950 = vmatpush3.bf16.msra.mxu1 %v2076_v9 }
 0x177   : > { %1845 = vmatprep.subr.bf16.mxu0 %v2077_v16  ;;  %1943 = vmatprep.subr.bf16.mxu1 %v2077_v16 }
 0x17a   : > { %1846 = vmatpush3.bf16.msra.mxu0 %v2077_v16  ;;  %1951 = vmatpush3.bf16.msra.mxu1 %v2077_v16 }
 0x17b   : > { %1847 = vmatprep.subr.bf16.mxu0 %v2078_v17  ;;  %1944 = vmatprep.subr.bf16.mxu1 %v2078_v17 }
 0x17e   : > { %1848 = vmatpush3.bf16.msra.mxu0 %v2078_v17  ;;  %1952 = vmatpush3.bf16.msra.mxu1 %v2078_v17 }
 0x181   : > { %1850 = vmatmul.mubr.bf16.vlgmr.msra.gmra.mxu0 %v1534_v6  ;;  %1858 = vmatmul.mubr.bf16.vlgmr.msra.gmra.mxu1 %v1538_v7 }
 0x182   : > { %1853 = vmatprep.mubr.bf16.mxu0 %v1535_v40  ;;  %1861 = vmatprep.mubr.bf16.mxu1 %v1539_v41 }
 0x189   : > { %1854 = vmatmul.mubr.bf16.gmra.mxu0 %v1536_v42  ;;  %1862 = vmatmul.mubr.bf16.gmra.mxu1 %v1540_v10 }
 0x241   : > { %v1851_v11 = vpop.f32.mrf.mxu0  ;;  %v1859_v18 = vpop.f32.mrf.mxu1 }
 0x242   : > { %v812_v20 = vadd.f32 %v1851_v11, %v2484_v26  ;;  %v844_v21 = vadd.f32 %v1859_v18, %v2501_v34 }
 0x243   : > { %v803_v19 = vpop.f32.mrf.mxu0  ;;  %v835_v43 = vpop.f32.mrf.mxu1 }
 0x244   : > { %v804_v14 = vadd.f32 %v803_v19, %v2478_v24  ;;  %v836_v15 = vadd.f32 %v835_v43, %v2497_v32 }
 0x245   : > { %v1852_v12 = vpop.f32.mrf.mxu0  ;;  %v1860_v13 = vpop.f32.mrf.mxu1 }
 0x246   : > { %v815_v44 = vadd.f32 %v1852_v12, %v2486_v27  ;;  %v847_v45 = vadd.f32 %v1860_v13, %v2503_v35 }
 0x247   : > { %v806_v22 = vpop.f32.mrf.mxu0  ;;  %v838_v23 = vpop.f32.mrf.mxu1 }
 0x248   : > { %v1652_v46 = vpack.c.bf16 %v815_v44, %v812_v20  ;;  %v1672_v47 = vpack.c.bf16 %v847_v45, %v844_v21  ;;  %v807_v48 = vadd.f32 %v806_v22, %v2480_v25  ;;  %v839_v49 = vadd.f32 %v838_v23, %v2499_v33 }
 0x249   : > { %v1855_v50 = vpop.f32.mrf.mxu0  ;;  %v1863_v26 = vpop.f32.mrf.mxu1 }
 0x24a   : > { %1723 = vst [vmem:[#allocation2 + $0x8] sm:$0xff] %v1652_v46   ;;  %1727 = vst [vmem:[#allocation2 + $0x28] sm:$0xff] %v1672_v47   ;;  %v1647_v34 = vpack.c.bf16 %v807_v48, %v804_v14  ;;  %v1667_v27 = vpack.c.bf16 %v839_v49, %v836_v15  ;;  %v828_v52 = vadd.f32 %v1855_v50, %v2493_v30 }
 0x24b   : > { %v819_v51 = vpop.f32.mrf.mxu0  ;;  %v851_v35 = vpop.f32.mrf.mxu1  ;;  %v860_v53 = vadd.f32 %v1863_v26, %v2511_v38 }
 0x24c   : > { %1648 = vst [vmem:[#allocation2] sm:$0xff] %v1647_v34   ;;  %1726 = vst [vmem:[#allocation2 + $0x20] sm:$0xff] %v1667_v27   ;;  %v820_v54 = vadd.f32 %v819_v51, %v2488_v28  ;;  %v852_v55 = vadd.f32 %v851_v35, %v2505_v36 }
 0x24d   : > { %v1856_v24 = vpop.f32.mrf.mxu0  ;;  %v1864_v32 = vpop.f32.mrf.mxu1 }
 0x24e   : > { %v831_v25 = vadd.f32 %v1856_v24, %v2495_v31  ;;  %v863_v33 = vadd.f32 %v1864_v32, %v2513_v39 }
 0x24f   : > { %v822_v56 = vpop.f32.mrf.mxu0  ;;  %v854_v57 = vpop.f32.mrf.mxu1 }
 0x250   : > { %v1662_v58 = vpack.c.bf16 %v831_v25, %v828_v52  ;;  %v1682_v59 = vpack.c.bf16 %v863_v33, %v860_v53  ;;  %v823_v60 = vadd.f32 %v822_v56, %v2491_v29  ;;  %v855_v61 = vadd.f32 %v854_v57, %v2507_v37 }
 0x252   : > { %1725 = vst [vmem:[#allocation2 + $0x18] sm:$0xff] %v1662_v58   ;;  %1729 = vst [vmem:[#allocation2 + $0x38] sm:$0xff] %v1682_v59   ;;  %v1657_v30 = vpack.c.bf16 %v823_v60, %v820_v54  ;;  %v1677_v38 = vpack.c.bf16 %v855_v61, %v852_v55 }
 0x254   : > { %1724 = vst [vmem:[#allocation2 + $0x10] sm:$0xff] %v1657_v30   ;;  %1728 = vst [vmem:[#allocation2 + $0x30] sm:$0xff] %v1677_v38  }
 0x255 PF: > { %p1565_p8 = scmp.ne.s32.totalorder %s2301_s18, 9 }
 0x257   : > { %953 = sbr.rel (%p1565_p8) target bundleno = 1182 (0x49e), region = 72 }
 0x25c   : > { %v1021_v28 = vld [vmem:[#allocation10 + $0x78] sm:$0xff]  ;;  %v1020_v31 = vld [vmem:[#allocation10 + $0x70] sm:$0xff]  ;;  %v1019_v36 = vld [vmem:[#allocation10 + $0x68] sm:$0xff]  ;;  %v1174_v56 = vlaneseq }
 0x25d   : > { %1865 = vmatprep.subr.mxu0 %v1021_v28  ;;  %1953 = vmatprep.subr.mxu1 %v1021_v28  ;;  %v1018_v29 = vld [vmem:[#allocation10 + $0x60] sm:$0xff]  ;;  %v1017_v37 = vld [vmem:[#allocation10 + $0x58] sm:$0xff]  ;;  %v1016_v39 = vld [vmem:[#allocation10 + $0x50] sm:$0xff] }
 0x25e   : > { %1866 = vmatpush3.msra.mxu0 %v1021_v28  ;;  %1969 = vmatpush3.msra.mxu1 %v1021_v28  ;;  %v1015_v62 = vld [vmem:[#allocation10 + $0x48] sm:$0xff]  ;;  %v1014_v63 = vld [vmem:[#allocation10 + $0x40] sm:$0xff]  ;;  %v1013_v0 = vld [vmem:[#allocation10 + $0x38] sm:$0xff]  ;;  %v2584_v57 = vand.u32 127, %v1174_v56 }
 0x25f   : > { %1867 = vmatprep.subr.mxu0 %v1020_v31  ;;  %1954 = vmatprep.subr.mxu1 %v1020_v31  ;;  %v1012_v1 = vld [vmem:[#allocation10 + $0x30] sm:$0xff]  ;;  %v1011_v2 = vld [vmem:[#allocation10 + $0x28] sm:$0xff]  ;;  %v1010_v3 = vld [vmem:[#allocation10 + $0x20] sm:$0xff] }
 0x260   : > { %1868 = vmatpush3.msra.mxu0 %v1020_v31  ;;  %1970 = vmatpush3.msra.mxu1 %v1020_v31  ;;  %v1009_v4 = vld [vmem:[#allocation10 + $0x18] sm:$0xff]  ;;  %v1685_v5 = vld [vmem:[#allocation2] sm:$0xff]   ;;  %v1008_v9 = vld [vmem:[#allocation10 + $0x10] sm:$0xff]  ;;  %vm1176_vm0 = vcmp.lt.s32.totalorder %v2584_v57, 8 }
 0x261   : > { %1869 = vmatprep.subr.mxu0 %v1019_v36  ;;  %1955 = vmatprep.subr.mxu1 %v1019_v36  ;;  %v1733_v8 = vld [vmem:[#allocation2 + $0x20] sm:$0xff]   ;;  %v1730_v16 = vld [vmem:[#allocation2 + $0x8] sm:$0xff]   ;;  %v1686_v6 = vunpack.c.l.bf16 %v1685_v5  ;;  %v1687_v41 = vunpack.c.h.bf16 %v1685_v5  ;;  %v1731_v19 = vld [vmem:[#allocation2 + $0x10] sm:$0xff]  }
 0x262   : > { %1870 = vmatpush3.msra.mxu0 %v1019_v36  ;;  %1971 = vmatpush3.msra.mxu1 %v1019_v36  ;;  %v1734_v17 = vld [vmem:[#allocation2 + $0x28] sm:$0xff]   ;;  %v1702_v7 = vunpack.c.l.bf16 %v1733_v8  ;;  %v1703_v42 = vunpack.c.h.bf16 %v1733_v8  ;;  %v1690_v10 = vunpack.c.l.bf16 %v1730_v16  ;;  %v1006_v18 = vld [vmem:[#allocation10] sm:$0xff]  ;;  %v1735_v43 = vld [vmem:[#allocation2 + $0x30] sm:$0xff]   ;;  %v1691_v44 = vunpack.c.h.bf16 %v1730_v16 }
 0x263   : > { %1871 = vmatprep.subr.mxu0 %v1018_v29  ;;  %1956 = vmatprep.subr.mxu1 %v1018_v29  ;;  %v1007_v40 = vld [vmem:[#allocation10 + $0x8] sm:$0xff]  ;;  %v1706_v11 = vunpack.c.l.bf16 %v1734_v17  ;;  %v990_v12 = vmax.f32 %v1686_v6, 0.0  ;;  %v991_v20 = vmax.f32 %v1687_v41, 0.0  ;;  %v1707_v45 = vunpack.c.h.bf16 %v1734_v17  ;;  %v1732_v46 = vld [vmem:[#allocation2 + $0x18] sm:$0xff]   ;;  %v1566_v58 = vld [vmem:[%s2796_s4] ss:$0 sm:$0xff] }
 0x264   : > { %1872 = vmatpush3.msra.mxu0 %v1018_v29  ;;  %1972 = vmatpush3.msra.mxu1 %v1018_v29  ;;  %v998_v13 = vmax.f32 %v1702_v7, 0.0  ;;  %v999_v21 = vmax.f32 %v1703_v42, 0.0  ;;  %v992_v14 = vmax.f32 %v1690_v10, 0.0  ;;  %v1694_v22 = vunpack.c.l.bf16 %v1731_v19  ;;  %v1736_v47 = vld [vmem:[#allocation2 + $0x38] sm:$0xff]  }
 0x265   : > { %1873 = vmatprep.subr.mxu0 %v1017_v37  ;;  %1957 = vmatprep.subr.mxu1 %v1017_v37  ;;  %v1000_v15 = vmax.f32 %v1706_v11, 0.0  ;;  %v1710_v23 = vunpack.c.l.bf16 %v1735_v43  ;;  %v993_v48 = vmax.f32 %v1691_v44, 0.0  ;;  %v1001_v49 = vmax.f32 %v1707_v45, 0.0 }
 0x266   : > { %1874 = vmatpush3.msra.mxu0 %v1017_v37  ;;  %1973 = vmatpush3.msra.mxu1 %v1017_v37  ;;  %v1695_v50 = vunpack.c.h.bf16 %v1731_v19  ;;  %v1711_v26 = vunpack.c.h.bf16 %v1735_v43  ;;  %v994_v34 = vmax.f32 %v1694_v22, 0.0  ;;  %v1698_v51 = vunpack.c.l.bf16 %v1732_v46 }
 0x267   : > { %1875 = vmatprep.subr.mxu0 %v1016_v39  ;;  %1958 = vmatprep.subr.mxu1 %v1016_v39  ;;  %v1002_v27 = vmax.f32 %v1710_v23, 0.0  ;;  %v1714_v35 = vunpack.c.l.bf16 %v1736_v47  ;;  %v1699_v52 = vunpack.c.h.bf16 %v1732_v46  ;;  %v1715_v53 = vunpack.c.h.bf16 %v1736_v47 }
 0x268   : > { %1876 = vmatpush3.msra.mxu0 %v1016_v39  ;;  %1974 = vmatpush3.msra.mxu1 %v1016_v39  ;;  %v995_v24 = vmax.f32 %v1695_v50, 0.0  ;;  %v1003_v32 = vmax.f32 %v1711_v26, 0.0  ;;  %v996_v25 = vmax.f32 %v1698_v51, 0.0 }
 0x269   : > { %1877 = vmatprep.subr.mxu0 %v1015_v62  ;;  %1959 = vmatprep.subr.mxu1 %v1015_v62  ;;  %v1004_v33 = vmax.f32 %v1714_v35, 0.0  ;;  %v997_v54 = vmax.f32 %v1699_v52, 0.0  ;;  %v1005_v55 = vmax.f32 %v1715_v53, 0.0 }
 0x26a   : > { %1878 = vmatpush3.msra.mxu0 %v1015_v62  ;;  %1975 = vmatpush3.msra.mxu1 %v1015_v62 }
 0x26b   : > { %1879 = vmatprep.subr.mxu0 %v1014_v63  ;;  %1960 = vmatprep.subr.mxu1 %v1014_v63 }
 0x26c   : > { %1880 = vmatpush3.msra.mxu0 %v1014_v63  ;;  %1976 = vmatpush3.msra.mxu1 %v1014_v63 }
 0x26d   : > { %1881 = vmatprep.subr.mxu0 %v1013_v0  ;;  %1961 = vmatprep.subr.mxu1 %v1013_v0 }
 0x26e   : > { %1882 = vmatpush3.msra.mxu0 %v1013_v0  ;;  %1977 = vmatpush3.msra.mxu1 %v1013_v0 }
 0x26f   : > { %1883 = vmatprep.subr.mxu0 %v1012_v1  ;;  %1962 = vmatprep.subr.mxu1 %v1012_v1 }
 0x270   : > { %1884 = vmatpush3.msra.mxu0 %v1012_v1  ;;  %1978 = vmatpush3.msra.mxu1 %v1012_v1 }
 0x271   : > { %1885 = vmatprep.subr.mxu0 %v1011_v2  ;;  %1963 = vmatprep.subr.mxu1 %v1011_v2 }
 0x272   : > { %1886 = vmatpush3.msra.mxu0 %v1011_v2  ;;  %1979 = vmatpush3.msra.mxu1 %v1011_v2 }
 0x273   : > { %1887 = vmatprep.subr.mxu0 %v1010_v3  ;;  %1964 = vmatprep.subr.mxu1 %v1010_v3 }
 0x274   : > { %1888 = vmatpush3.msra.mxu0 %v1010_v3  ;;  %1980 = vmatpush3.msra.mxu1 %v1010_v3 }
 0x275   : > { %1889 = vmatprep.subr.mxu0 %v1009_v4  ;;  %1965 = vmatprep.subr.mxu1 %v1009_v4 }
 0x276   : > { %1890 = vmatpush3.msra.mxu0 %v1009_v4  ;;  %1981 = vmatpush3.msra.mxu1 %v1009_v4 }
 0x277   : > { %1891 = vmatprep.subr.mxu0 %v1008_v9  ;;  %1966 = vmatprep.subr.mxu1 %v1008_v9 }
 0x278   : > { %1892 = vmatpush3.msra.mxu0 %v1008_v9  ;;  %1982 = vmatpush3.msra.mxu1 %v1008_v9 }
 0x279   : > { %1893 = vmatprep.subr.mxu0 %v1007_v40  ;;  %1967 = vmatprep.subr.mxu1 %v1007_v40 }
 0x27a   : > { %1894 = vmatpush3.msra.mxu0 %v1007_v40  ;;  %1983 = vmatpush3.msra.mxu1 %v1007_v40 }
 0x27b   : > { %1895 = vmatprep.subr.mxu0 %v1006_v18  ;;  %1968 = vmatprep.subr.mxu1 %v1006_v18 }
 0x27c   : > { %1896 = vmatpush3.msra.mxu0 %v1006_v18  ;;  %1984 = vmatpush3.msra.mxu1 %v1006_v18 }
 0x27d   : > { %1897 = vmatprep.mubr.f32.mxu0 %v990_v12  ;;  %1909 = vmatprep.mubr.f32.mxu1 %v998_v13 }
 0x27e   : > { %1898 = vmatmul.mubr.f32.vlgmr.msra.gmra.mxu0 %v991_v20  ;;  %1910 = vmatmul.mubr.f32.vlgmr.msra.gmra.mxu1 %v999_v21 }
 0x27f   : > { %1900 = vmatprep.mubr.f32.mxu0 %v992_v14  ;;  %1912 = vmatprep.mubr.f32.mxu1 %v1000_v15 }
 0x282   : > { %1901 = vmatmul.mubr.f32.gmra.mxu0 %v993_v48  ;;  %1913 = vmatmul.mubr.f32.gmra.mxu1 %v1001_v49 }
 0x283   : > { %1903 = vmatprep.mubr.f32.mxu0 %v994_v34  ;;  %1915 = vmatprep.mubr.f32.mxu1 %v1002_v27 }
 0x286   : > { %1904 = vmatmul.mubr.f32.gmra.mxu0 %v995_v24  ;;  %1916 = vmatmul.mubr.f32.gmra.mxu1 %v1003_v32 }
 0x287   : > { %1906 = vmatprep.mubr.f32.mxu0 %v996_v25  ;;  %1918 = vmatprep.mubr.f32.mxu1 %v1004_v33 }
 0x28a   : > { %1907 = vmatmul.mubr.f32.gmra.mxu0 %v997_v54  ;;  %1919 = vmatmul.mubr.f32.gmra.mxu1 %v1005_v55 }
 0x33e   : > { %v1899_v59 = vpop.f32.mrf.mxu0  ;;  %v1911_v60 = vpop.f32.mrf.mxu1 }
 0x33f   : > { %v1101_v61 = vadd.f32 %v1899_v59, %v1566_v58  ;;  %v1141_v30 = vadd.f32 %v1911_v60, %v1566_v58 }
 0x340   : > { %v1095_v38 = vpop.f32.mrf.mxu0  ;;  %v1135_v28 = vpop.f32.mrf.mxu1 }
 0x341   : > { %v1096_v31 = vadd.f32 %v1566_v58, %v1095_v38  ;;  %v2592_v36 = vsel %vm1176_vm0, %v1141_v30, -1e+30  ;;  %v2596_v29 = vsel %vm1176_vm0, %v1101_v61, -1e+30  ;;  %v1136_v1 = vadd.f32 %v1566_v58, %v1135_v28 }
 0x342   : > { %1211 = vmax.xlane.f32.xlu1 %v2592_v36  ;;  %1195 = vmax.xlane.f32.xlu0 %v2596_v29  ;;  %v1902_v37 = vpop.f32.mrf.mxu0  ;;  %v1914_v39 = vpop.f32.mrf.mxu1 }
 0x343   : > { %v1111_v62 = vadd.f32 %v1902_v37, %v1566_v58  ;;  %v1151_v63 = vadd.f32 %v1914_v39, %v1566_v58  ;;  %v2606_v3 = vsel %vm1176_vm0, %v1096_v31, -1e+30  ;;  %v2616_v7 = vsel %vm1176_vm0, %v1136_v1, -1e+30 }
 0x344   : > { %v1105_v0 = vpop.f32.mrf.mxu0  ;;  %v1145_v4 = vpop.f32.mrf.mxu1 }
 0x345   : > { %v2602_v2 = vsel %vm1176_vm0, %v1111_v62, -1e+30  ;;  %v2612_v8 = vsel %vm1176_vm0, %v1151_v63, -1e+30  ;;  %v1106_v17 = vadd.f32 %v1566_v58, %v1105_v0  ;;  %v1146_v6 = vadd.f32 %v1566_v58, %v1145_v4 }
 0x346   : > { %1199 = vmax.xlane.f32.xlu1 %v2602_v2  ;;  %1193 = vmax.xlane.f32.xlu0 %v2606_v3  ;;  %v1905_v5 = vpop.f32.mrf.mxu0  ;;  %v1917_v16 = vpop.f32.mrf.mxu1 }
 0x347   : > { %v1121_v40 = vadd.f32 %v1905_v5, %v1566_v58  ;;  %v2622_v11 = vsel %vm1176_vm0, %v1106_v17, -1e+30  ;;  %v2626_v18 = vsel %vm1176_vm0, %v1146_v6, -1e+30  ;;  %v1161_v19 = vadd.f32 %v1917_v16, %v1566_v58 }
 0x348   : > { %v1115_v9 = vpop.f32.mrf.mxu0  ;;  %v1155_v42 = vpop.f32.mrf.mxu1 }
 0x349   : > { %v1116_v41 = vadd.f32 %v1566_v58, %v1115_v9  ;;  %v1156_v43 = vadd.f32 %v1566_v58, %v1155_v42  ;;  %v2632_v12 = vsel %vm1176_vm0, %v1121_v40, -1e+30  ;;  %v2642_v14 = vsel %vm1176_vm0, %v1161_v19, -1e+30 }
 0x34a   : > { %1215 = vmax.xlane.f32.xlu1 %v2612_v8  ;;  %1209 = vmax.xlane.f32.xlu0 %v2616_v7  ;;  %v1908_v10 = vpop.f32.mrf.mxu0  ;;  %v1920_v21 = vpop.f32.mrf.mxu1 }
 0x34b   : > { %v2636_v13 = vsel %vm1176_vm0, %v1116_v41, -1e+30  ;;  %v1131_v44 = vadd.f32 %v1908_v10, %v1566_v58  ;;  %v2646_v15 = vsel %vm1176_vm0, %v1156_v43, -1e+30  ;;  %v1171_v23 = vadd.f32 %v1920_v21, %v1566_v58 }
 0x34c   : > { %v1125_v20 = vpop.f32.mrf.mxu0  ;;  %v1165_v22 = vpop.f32.mrf.mxu1 }
 0x34d   : > { %v1126_v45 = vadd.f32 %v1566_v58, %v1125_v20  ;;  %v1166_v46 = vadd.f32 %v1566_v58, %v1165_v22  ;;  %v2652_v47 = vsel %vm1176_vm0, %v1131_v44, -1e+30  ;;  %v2662_v49 = vsel %vm1176_vm0, %v1171_v23, -1e+30 }
 0x34e   : > { %1197 = vmax.xlane.f32.xlu1 %v2622_v11  ;;  %1213 = vmax.xlane.f32.xlu0 %v2626_v18 }
 0x34f   : > { %v2656_v48 = vsel %vm1176_vm0, %v1126_v45, -1e+30  ;;  %v2666_v50 = vsel %vm1176_vm0, %v1166_v46, -1e+30 }
 0x352   : > { %1203 = vmax.xlane.f32.xlu1 %v2632_v12  ;;  %1201 = vmax.xlane.f32.xlu0 %v2636_v13 }
 0x356   : > { %1219 = vmax.xlane.f32.xlu1 %v2642_v14  ;;  %1217 = vmax.xlane.f32.xlu0 %v2646_v15 }
 0x35a   : > { %1207 = vmax.xlane.f32.xlu1 %v2652_v47  ;;  %1205 = vmax.xlane.f32.xlu0 %v2656_v48 }
 0x35e   : > { %1223 = vmax.xlane.f32.xlu1 %v2662_v49  ;;  %1221 = vmax.xlane.f32.xlu0 %v2666_v50 }
 0x3cb   : > { %v2670_v26 = vpop.xlane.xlu1 %1211  ;;  %v2672_v34 = vpop.xlane.xlu0 %1195 }
 0x3cc   : > { %v1234_v27 = vsub.f32 %v2592_v36, %v2670_v26  ;;  %v1226_v51 = vsub.f32 %v2596_v29, %v2672_v34 }
 0x3ce   : > { %v1243_v35 = vmul.f32 1.442695, %v1226_v51  ;;  %v1259_v52 = vmul.f32 1.442695, %v1234_v27 }
 0x3cf   : > { %v2678_v24 = vpop.xlane.xlu1 %1199  ;;  %v2680_v32 = vpop.xlane.xlu0 %1193 }
 0x3d0   : > { %v1228_v53 = vsub.f32 %v2602_v2, %v2678_v24  ;;  %v1225_v25 = vsub.f32 %v2606_v3, %v2680_v32  ;;  %2079 = vpow2.f32 %v1243_v35 }
 0x3d1   : > { %2081 = vpow2.f32 %v1259_v52 }
 0x3d2   : > { %v1241_v33 = vmul.f32 1.442695, %v1225_v25  ;;  %v1247_v56 = vmul.f32 1.442695, %v1228_v53 }
 0x3d3   : > { %v2686_v54 = vpop.xlane.xlu1 %1215  ;;  %v2688_v55 = vpop.xlane.xlu0 %1209 }
 0x3d4   : > { %v1233_v57 = vsub.f32 %v2616_v7, %v2688_v55  ;;  %2083 = vpow2.f32 %v1241_v33  ;;  %v1236_v58 = vsub.f32 %v2612_v8, %v2686_v54 }
 0x3d5   : > { %2085 = vpow2.f32 %v1247_v56 }
 0x3d6   : > { %v1257_v59 = vmul.f32 1.442695, %v1233_v57  ;;  %v1263_v38 = vmul.f32 1.442695, %v1236_v58 }
 0x3d7   : > { %v2694_v60 = vpop.xlane.xlu1 %1197  ;;  %v2696_v61 = vpop.xlane.xlu0 %1213 }
 0x3d8   : > { %v1227_v30 = vsub.f32 %v2622_v11, %v2694_v60  ;;  %2087 = vpow2.f32 %v1257_v59  ;;  %v1235_v28 = vsub.f32 %v2626_v18, %v2696_v61 }
 0x3da   : > { %v1245_v31 = vmul.f32 1.442695, %v1227_v30  ;;  %v1261_v63 = vmul.f32 1.442695, %v1235_v28 }
 0x3db   : > { %v2702_v37 = vpop.xlane.xlu1 %1203  ;;  %v2704_v39 = vpop.xlane.xlu0 %1201 }
 0x3dc   : > { %2089 = vpow2.f32 %v1245_v31  ;;  %v1230_v62 = vsub.f32 %v2632_v12, %v2702_v37  ;;  %v1229_v0 = vsub.f32 %v2636_v13, %v2704_v39 }
 0x3dd   : > { %2091 = vpow2.f32 %v1263_v38  ;;  %v2080_v1 = vpop.eup %2079 }
 0x3de   : > { %v1251_v4 = vmul.f32 1.442695, %v1230_v62  ;;  %1275 = vadd.xlane.f32.xlu1 %v2080_v1  ;;  %v2082_v17 = vpop.eup %2081  ;;  %v1249_v6 = vmul.f32 1.442695, %v1229_v0 }
 0x3df   : > { %v2710_v5 = vpop.xlane.xlu1 %1219  ;;  %v2712_v9 = vpop.xlane.xlu0 %1217 }
 0x3e0   : > { %2093 = vpow2.f32 %v1251_v4  ;;  %v1238_v16 = vsub.f32 %v2642_v14, %v2710_v5  ;;  %v1237_v40 = vsub.f32 %v2646_v15, %v2712_v9 }
 0x3e1   : > { %2095 = vpow2.f32 %v1261_v63  ;;  %v2084_v41 = vpop.eup %2083 }
 0x3e2   : > { %v1267_v42 = vmul.f32 1.442695, %v1238_v16  ;;  %1291 = vadd.xlane.f32.xlu1 %v2082_v17  ;;  %1273 = vadd.xlane.f32.xlu0 %v2084_v41  ;;  %v2086_v20 = vpop.eup %2085  ;;  %v1265_v21 = vmul.f32 1.442695, %v1237_v40 }
 0x3e3   : > { %v2718_v10 = vpop.xlane.xlu1 %1207  ;;  %v2720_v19 = vpop.xlane.xlu0 %1205 }
 0x3e4   : > { %2097 = vpow2.f32 %v1267_v42  ;;  %v1232_v43 = vsub.f32 %v2652_v47, %v2718_v10  ;;  %v1231_v44 = vsub.f32 %v2656_v48, %v2720_v19 }
 0x3e5   : > { %2099 = vpow2.f32 %v1249_v6  ;;  %v2088_v45 = vpop.eup %2087 }
 0x3e6   : > { %v1255_v22 = vmul.f32 1.442695, %v1232_v43  ;;  %1279 = vadd.xlane.f32.xlu1 %v2086_v20  ;;  %1289 = vadd.xlane.f32.xlu0 %v2088_v45  ;;  %v1253_v35 = vmul.f32 1.442695, %v1231_v44 }
 0x3e7   : > { %v2726_v23 = vpop.xlane.xlu1 %1223  ;;  %v2728_v46 = vpop.xlane.xlu0 %1221 }
 0x3e8   : > { %2101 = vpow2.f32 %v1255_v22  ;;  %v1240_v27 = vsub.f32 %v2662_v49, %v2726_v23  ;;  %v1239_v52 = vsub.f32 %v2666_v50, %v2728_v46 }
 0x3e9   : > { %v2090_v51 = vpop.eup %2089  ;;  %2103 = vpow2.f32 %v1265_v21 }
 0x3ea   : > { %v2092_v53 = vpop.eup %2091  ;;  %v1271_v25 = vmul.f32 1.442695, %v1240_v27  ;;  %1277 = vadd.xlane.f32.xlu0 %v2090_v51  ;;  %v1269_v56 = vmul.f32 1.442695, %v1239_v52 }
 0x3eb   : > { %1295 = vadd.xlane.f32.xlu1 %v2092_v53 }
 0x3ec   : > { %2105 = vpow2.f32 %v1271_v25 }
 0x3ed   : > { %v2094_v33 = vpop.eup %2093  ;;  %2107 = vpow2.f32 %v1253_v35 }
 0x3ee   : > { %v2096_v57 = vpop.eup %2095  ;;  %2109 = vpow2.f32 %v1269_v56 }
 0x3ef   : > { %1283 = vadd.xlane.f32.xlu1 %v2094_v33  ;;  %1293 = vadd.xlane.f32.xlu0 %v2096_v57 }
 0x3f1   : > { %v2098_v58 = vpop.eup %2097 }
 0x3f2   : > { %v2100_v59 = vpop.eup %2099 }
 0x3f3   : > { %1299 = vadd.xlane.f32.xlu1 %v2098_v58  ;;  %1281 = vadd.xlane.f32.xlu0 %v2100_v59 }
 0x3f5   : > { %v2102_v30 = vpop.eup %2101 }
 0x3f6   : > { %v2104_v38 = vpop.eup %2103 }
 0x3f7   : > { %1287 = vadd.xlane.f32.xlu1 %v2102_v30  ;;  %1297 = vadd.xlane.f32.xlu0 %v2104_v38 }
 0x3f9   : > { %v2106_v28 = vpop.eup %2105 }
 0x3fa   : > { %v2108_v31 = vpop.eup %2107 }
 0x3fb   : > { %1303 = vadd.xlane.f32.xlu1 %v2106_v28  ;;  %1285 = vadd.xlane.f32.xlu0 %v2108_v31  ;;  %v2110_v62 = vpop.eup %2109 }
 0x3ff   : > { %1301 = vadd.xlane.f32.xlu0 %v2110_v62 }
 0x467   : > { %v1276_v63 = vpop.xlane.xlu1 %1275 }
 0x468   : > { %2111 = vlog2.f32 %v1276_v63 }
 0x46b   : > { %v1292_v0 = vpop.xlane.xlu1 %1291  ;;  %v1274_v1 = vpop.xlane.xlu0 %1273 }
 0x46c   : > { %2113 = vlog2.f32 %v1292_v0 }
 0x46d   : > { %2115 = vlog2.f32 %v1274_v1 }
 0x46f   : > { %v1280_v4 = vpop.xlane.xlu1 %1279  ;;  %v1290_v16 = vpop.xlane.xlu0 %1289 }
 0x470   : > { %2117 = vlog2.f32 %v1280_v4 }
 0x471   : > { %2119 = vlog2.f32 %v1290_v16 }
 0x473   : > { %v1278_v6 = vpop.xlane.xlu0 %1277 }
 0x474   : > { %v1296_v17 = vpop.xlane.xlu1 %1295 }
 0x475   : > { %2121 = vlog2.f32 %v1296_v17  ;;  %v2112_v40 = vpop.eup %2111 }
 0x476   : > { %2123 = vlog2.f32 %v1278_v6  ;;  %v1308_v41 = vmul.f32 0.6931472, %v2112_v40 }
 0x478   : > { %v1284_v42 = vpop.xlane.xlu1 %1283  ;;  %v1294_v43 = vpop.xlane.xlu0 %1293  ;;  %v1338_v20 = vadd.f32 %v1308_v41, %v2672_v34 }
 0x479   : > { %2125 = vlog2.f32 %v1284_v42  ;;  %v2114_v21 = vpop.eup %2113 }
 0x47a   : > { %2127 = vlog2.f32 %v1294_v43  ;;  %v2116_v44 = vpop.eup %2115  ;;  %v1354_v45 = vsub.f32 %v2596_v29, %v1338_v20  ;;  %v1324_v22 = vmul.f32 0.6931472, %v2114_v21 }
 0x47b   : > { %v1306_v27 = vmul.f32 0.6931472, %v2116_v44 }
 0x47c   : > { %v1300_v51 = vpop.xlane.xlu1 %1299  ;;  %v1282_v35 = vpop.xlane.xlu0 %1281  ;;  %1371 = vst [vmem:[#allocation12 + $0x8] sm:$0xff] %v1354_v45  ;;  %v1346_v52 = vadd.f32 %v1324_v22, %v2670_v26 }
 0x47d   : > { %2129 = vlog2.f32 %v1300_v51  ;;  %v2118_v53 = vpop.eup %2117  ;;  %v1337_v25 = vadd.f32 %v1306_v27, %v2680_v32 }
 0x47e   : > { %2131 = vlog2.f32 %v1282_v35  ;;  %v2120_v33 = vpop.eup %2119  ;;  %v1362_v34 = vsub.f32 %v2592_v36, %v1346_v52  ;;  %v1312_v56 = vmul.f32 0.6931472, %v2118_v53 }
 0x47f   : > { %v1353_v57 = vsub.f32 %v2606_v3, %v1337_v25  ;;  %v1322_v58 = vmul.f32 0.6931472, %v2120_v33 }
 0x480   : > { %v1288_v29 = vpop.xlane.xlu1 %1287  ;;  %v1298_v59 = vpop.xlane.xlu0 %1297  ;;  %1379 = vst [vmem:[#allocation12 + $0x48] sm:$0xff] %v1362_v34  ;;  %v1340_v30 = vadd.f32 %v1312_v56, %v2678_v24 }
 0x481   : > { %2133 = vlog2.f32 %v1288_v29  ;;  %1370 = vst [vmem:[#allocation12] sm:$0xff] %v1353_v57  ;;  %v1345_v26 = vadd.f32 %v1322_v58, %v2688_v55 }
 0x482   : > { %v2122_v38 = vpop.eup %2121  ;;  %2135 = vlog2.f32 %v1298_v59  ;;  %v1356_v28 = vsub.f32 %v2602_v2, %v1340_v30 }
 0x483   : > { %v2124_v32 = vpop.eup %2123  ;;  %v1328_v31 = vmul.f32 0.6931472, %v2122_v38  ;;  %v1361_v36 = vsub.f32 %v2616_v7, %v1345_v26 }
 0x484   : > { %v1310_v62 = vmul.f32 0.6931472, %v2124_v32  ;;  %v1304_v3 = vpop.xlane.xlu1 %1303  ;;  %v1286_v63 = vpop.xlane.xlu0 %1285  ;;  %1373 = vst [vmem:[#allocation12 + $0x18] sm:$0xff] %v1356_v28 }
 0x485   : > { %v1348_v0 = vadd.f32 %v1328_v31, %v2686_v54  ;;  %2137 = vlog2.f32 %v1304_v3  ;;  %1378 = vst [vmem:[#allocation12 + $0x40] sm:$0xff] %v1361_v36 }
 0x486   : > { %v2126_v24 = vpop.eup %2125  ;;  %v1339_v1 = vadd.f32 %v1310_v62, %v2694_v60  ;;  %2139 = vlog2.f32 %v1286_v63 }
 0x487   : > { %v2128_v55 = vpop.eup %2127  ;;  %v1364_v4 = vsub.f32 %v2612_v8, %v1348_v0  ;;  %v1316_v16 = vmul.f32 0.6931472, %v2126_v24 }
 0x488   : > { %v1355_v2 = vsub.f32 %v2622_v11, %v1339_v1  ;;  %v1326_v17 = vmul.f32 0.6931472, %v2128_v55  ;;  %v1302_v7 = vpop.xlane.xlu0 %1301 }
 0x489   : > { %1381 = vst [vmem:[#allocation12 + $0x58] sm:$0xff] %v1364_v4  ;;  %v1342_v6 = vadd.f32 %v1316_v16, %v2702_v37  ;;  %2141 = vlog2.f32 %v1302_v7 }
 0x48a   : > { %v2130_v40 = vpop.eup %2129  ;;  %1372 = vst [vmem:[#allocation12 + $0x10] sm:$0xff] %v1355_v2  ;;  %v1347_v54 = vadd.f32 %v1326_v17, %v2696_v61 }
 0x48b   : > { %v2132_v41 = vpop.eup %2131  ;;  %v1358_v60 = vsub.f32 %v2632_v12, %v1342_v6  ;;  %v1332_v42 = vmul.f32 0.6931472, %v2130_v40 }
 0x48c   : > { %v1363_v43 = vsub.f32 %v2626_v18, %v1347_v54  ;;  %v1314_v8 = vmul.f32 0.6931472, %v2132_v41 }
 0x48d   : > { %1375 = vst [vmem:[#allocation12 + $0x28] sm:$0xff] %v1358_v60  ;;  %v1350_v11 = vadd.f32 %v1332_v42, %v2710_v5 }
 0x48e   : > { %v2134_v20 = vpop.eup %2133  ;;  %1380 = vst [vmem:[#allocation12 + $0x50] sm:$0xff] %v1363_v43  ;;  %v1341_v21 = vadd.f32 %v1314_v8, %v2704_v39 }
 0x48f   : > { %v2136_v37 = vpop.eup %2135  ;;  %v1366_v44 = vsub.f32 %v2642_v14, %v1350_v11  ;;  %v1320_v45 = vmul.f32 0.6931472, %v2134_v20 }
 0x490   : > { %v1357_v61 = vsub.f32 %v2636_v13, %v1341_v21  ;;  %v1330_v22 = vmul.f32 0.6931472, %v2136_v37 }
 0x491   : > { %1383 = vst [vmem:[#allocation12 + $0x68] sm:$0xff] %v1366_v44  ;;  %v1344_v12 = vadd.f32 %v1320_v45, %v2718_v10 }
 0x492   : > { %v2138_v27 = vpop.eup %2137  ;;  %1374 = vst [vmem:[#allocation12 + $0x20] sm:$0xff] %v1357_v61  ;;  %v1349_v18 = vadd.f32 %v1330_v22, %v2712_v9 }
 0x493   : > { %v2140_v51 = vpop.eup %2139  ;;  %v1360_v5 = vsub.f32 %v2652_v47, %v1344_v12  ;;  %v1336_v35 = vmul.f32 0.6931472, %v2138_v27 }
 0x494   : > { %v1365_v39 = vsub.f32 %v2646_v15, %v1349_v18  ;;  %v1318_v52 = vmul.f32 0.6931472, %v2140_v51 }
 0x495   : > { %1377 = vst [vmem:[#allocation12 + $0x38] sm:$0xff] %v1360_v5  ;;  %v1352_v14 = vadd.f32 %v1336_v35, %v2726_v23 }
 0x496   : > { %v2142_v53 = vpop.eup %2141  ;;  %1382 = vst [vmem:[#allocation12 + $0x60] sm:$0xff] %v1365_v39  ;;  %v1343_v13 = vadd.f32 %v1318_v52, %v2720_v19 }
 0x497   : > { %v1368_v10 = vsub.f32 %v2662_v49, %v1352_v14  ;;  %v1334_v25 = vmul.f32 0.6931472, %v2142_v53 }
 0x498   : > { %v1359_v33 = vsub.f32 %v2656_v48, %v1343_v13 }
 0x499   : > { %1385 = vst [vmem:[#allocation12 + $0x78] sm:$0xff] %v1368_v10  ;;  %v1351_v9 = vadd.f32 %v1334_v25, %v2728_v46 }
 0x49a   : > { %1376 = vst [vmem:[#allocation12 + $0x30] sm:$0xff] %v1359_v33 }
 0x49b   : > { %v1367_v47 = vsub.f32 %v2666_v50, %v1351_v9 }
 0x49d   : > { %1384 = vst [vmem:[#allocation12 + $0x70] sm:$0xff] %v1367_v47 }
 0x49e PF: > { %p2768_p9 = scmp.eq.s32.totalorder %s1484_s21, 9  ;;  %s2319_s13 = smov [#allocation12]  }
 0x49f   : > { %s1392_s14 = sshll.u32 %s2319_s13, 4  ;;  %s1393_s14 = int_to_ptr.vmem [resolvable:$true] %s1392_s14 }
 0x4a0   : > { %s2247_s15 = scalar_lea.vmem %s1393_s14, 2048  ;;  %p2254_p6 = scmp.lt.s32.totalorder %s1393_s14, %s1393_s14 }
 0x4a1   : > { %p2248_p10 = scmp.ne.s32.totalorder %s1393_s14, %s2247_s15  ;;  %p2255_p13 = scmp.lt.s32.totalorder %s2247_s15, %s2247_s15 }
 0x4a3   : > { %p2249_p11 = pnand %p2248_p10, %p2768_p9  ;;  %p2256_p0 = por %p2255_p13, %p2254_p6 }
 0x4a5   : > { %p2250_p12 = pneg %p2249_p11 }
 0x4a7   : > { %p2257_p1 = pnand %p2256_p0, %p2250_p12 }
 0x4a9   : > { %2260 = shalt.err (!%p2257_p1)
}
 0x4aa   : > { %s2320_s16 = smov 128   ;;  %s2321_s21 = smov 8  }
 0x4ab   : > { %2002 = dma.vmem_to_hbm [thread:$0]  (%p2768_p9), %s1393_s14, 2048, %s2797_s5, [#allocation6], %s2320_s16, %s2320_s16, %s2321_s21  }
 0x4ac   : > { %2296 = dma.done.wait (%p2768_p9), [#allocation6], 2048  }
 0x4ad   : > { %2298 = vsyncadd (%p2768_p9), [#allocation6], 4294965248 }
 0x4ae PF: > { %s19_s20 = sadd.s32 1, %s2309_s20   ;;  %s2803_s18 = smov %s2305_s19 }
 0x4af   : > { %p16_p3 = scmp.ge.s32.totalorder %s19_s20, 12   ;;  %s2804_s19 = smov %s2806_s27 }
 0x4b1   :  { %18 = sbr.rel (!%p16_p3) target bundleno = 5 (0x5), region = 103 }
 0x4b6   :  { %1408 = vsyncpa [#allocation5], 1 }
 0x4b7   :  { %1410 = vsyncpa [#allocation5 + $0x1], 1 }
 0x4b8   :  { %1411 = vsyncpa [#allocation8], 1 }
 0x4b9   :  { %1412 = vsyncpa [#allocation11], 1 }
 0x4ba   :  { %1413 = vsyncpa [#allocation6], 1 }
 0x4bb   :  { %1415 = vsyncpa [#allocation6 + $0x1], 1 }

// kernel: tpu_custom_call.1
= control target key start
LH: loop header
LB: loop body
LE: loop exit
PB: predicated region body
PF: predicated region fallthrough
CT: control target
= control target key end

     0   :  { %10 = vsyncpa [#allocation5], 0  ;;  %s2792_s0 = inlined_call_operand.hbm [shape: bf16[128,128], index: 0, kind: input, shape index: {}]   ;;  %s2793_s1 = inlined_call_operand.hbm [shape: bf16[128,128], index: 1, kind: input, shape index: {}]   ;;  %s2794_s2 = inlined_call_operand.hbm [shape: f32[128,128], index: 2, kind: input, shape index: {}]   ;;  %s2795_s3 = inlined_call_operand.hbm [shape: f32[128,128], index: 3, kind: input, shape index: {}]   ;;  %s2796_s4 = inlined_call_operand.vmem [shape: f32[1,128], index: 4, kind: input, shape index: {}]   ;;  %s2797_s5 = inlined_call_operand.hbm [shape: f32[128,128], index: 5, kind: output, shape index: {}]  }
   0x1   :  { %11 = vsyncpa [#allocation8], 0 }
   0x2   :  { %12 = vsyncpa [#allocation11], 0 }
   0x3   :  { %13 = vsyncpa [#allocation6], 0  ;;  %s2352_s18 = smov 0   ;;  %s2354_s19 = smov 0  }
   0x4   :  { %s2356_s20 = smov 0  }
   0x5 LB: > { %s1484_s21 = sadd.s32 4294967295, %s2309_s20   ;;  %p1485_p0 = scmp.ge.s32.totalorder %s2309_s20, 1  ;;  %s2309_s20 = sphi %s2356_s20, %s19_s20   ;;  %s2305_s19 = sphi %s2354_s19, %s2804_s19   ;;  %s2301_s18 = sphi %s2352_s18, %s2803_s18  }
   0x6   : > { %p167_p1 = scmp.lt.s32.totalorder %s2309_s20, 11  ;;  %p2372_p2 = scmp.eq.s32.totalorder %s1484_s21, 0 }
   0x7   : > { %s2311_s24 = smov [#allocation7]   ;;  %s31_s27 = sadd.s32 1, %s2305_s19 }
   0x8   : > { %p2376_p3 = pnand %p1485_p0, %p167_p1  ;;  %s195_s25 = sshll.u32 %s2311_s24, 4  ;;  %s196_s25 = int_to_ptr.vmem [resolvable:$true] %s195_s25 }
   0x9   : > { %p2389_p6 = scmp.ge.s32.totalorder %s31_s27, 10  ;;  %s2312_s29 = smov [#allocation4]  }
   0xa   : > { %p2005_p4 = pneg %p2376_p3  ;;  %s182_s30 = sshll.u32 %s2312_s29, 4  ;;  %s183_s30 = int_to_ptr.vmem [resolvable:$true] %s182_s30 }
   0xb   : > { %s2154_s6 = scalar_lea.vmem %s196_s25, 1024  ;;  %p2162_p11 = scmp.lt.s32.totalorder %s196_s25, %s196_s25 }
   0xc   : > { %p2384_p5 = pnand %p2372_p2, %p2005_p4  ;;  %p2155_p8 = scmp.ne.s32.totalorder %s196_s25, %s2154_s6 }
   0xd   : > { %p2163_p12 = scmp.lt.s32.totalorder %s2154_s6, %s2154_s6 }
   0xe   : > { %p2145_p7 = pneg %p2384_p5 }
   0xf   : > { %p2164_p13 = por %p2163_p12, %p2162_p11 }
  0x10   : > { %p2157_p9 = pnand %p2155_p8, %p2145_p7 }
  0x12   : > { %p2158_p10 = pneg %p2157_p9 }
  0x14   : > { %p2165_p0 = pnand %p2164_p13, %p2158_p10 }
  0x16   : > { %2168 = shalt.err (!%p2165_p0)
}
  0x17   : > { %s2313_s7 = smov 64   ;;  %s2314_s8 = smov 4  }
  0x18   : > { %2011 = dma.hbm_to_vmem [thread:$0]  (!%p2384_p5), %s2793_s1, 1024, %s196_s25, [#allocation8], %s2313_s7, %s2313_s7, %s2314_s8  }
  0x19   : > { %s2806_s27 = smov (%p2389_p6, %s31_s27), 0  ;;  %s2180_s11 = scalar_lea.vmem %s183_s30, 1024 }
  0x1a   : > { %p2181_p1 = scmp.ne.s32.totalorder %s183_s30, %s2180_s11  ;;  %p2188_p9 = scmp.lt.s32.totalorder %s183_s30, %s183_s30 }
  0x1b   : > { %p2189_p10 = scmp.lt.s32.totalorder %s2180_s11, %s2180_s11 }
  0x1c   : > { %p2183_p4 = pnand %p2181_p1, %p2145_p7 }
  0x1d   : > { %p2190_p11 = por %p2189_p10, %p2188_p9 }
  0x1e   : > { %p2184_p8 = pneg %p2183_p4 }
  0x20   : > { %p2191_p12 = pnand %p2190_p11, %p2184_p8 }
  0x22   : > { %2194 = shalt.err (!%p2191_p12)
}
  0x23   : > { %2008 = dma.hbm_to_vmem [thread:$0]  (!%p2384_p5), %s2792_s0, 1024, %s183_s30, [#allocation5], %s2313_s7, %s2313_s7, %s2314_s8  }
  0x24   : > { %s2315_s14 = smov [#allocation9]  }
  0x25   : > { %s208_s15 = sshll.u32 %s2315_s14, 4  ;;  %s209_s15 = int_to_ptr.vmem [resolvable:$true] %s208_s15 }
  0x26   : > { %s2206_s16 = scalar_lea.vmem %s209_s15, 2048  ;;  %p2214_p1 = scmp.lt.s32.totalorder %s209_s15, %s209_s15 }
  0x27   : > { %p2207_p6 = scmp.ne.s32.totalorder %s209_s15, %s2206_s16  ;;  %p2215_p4 = scmp.lt.s32.totalorder %s2206_s16, %s2206_s16 }
  0x29   : > { %p2209_p13 = pnand %p2207_p6, %p2145_p7  ;;  %p2216_p8 = por %p2215_p4, %p2214_p1 }
  0x2b   : > { %p2210_p0 = pneg %p2209_p13 }
  0x2d   : > { %p2217_p9 = pnand %p2216_p8, %p2210_p0 }
  0x2f   : > { %2220 = shalt.err (!%p2217_p9)
}
  0x30   : > { %s2316_s17 = smov 128   ;;  %s2317_s24 = smov 8  }
  0x31   : > { %2014 = dma.hbm_to_vmem [thread:$0]  (!%p2384_p5), %s2794_s2, 2048, %s209_s15, [#allocation8], %s2316_s17, %s2316_s17, %s2317_s24  }
  0x32   : > { %s2318_s29 = smov [#allocation10]  }
  0x33   : > { %s221_s30 = sshll.u32 %s2318_s29, 4  ;;  %s222_s30 = int_to_ptr.vmem [resolvable:$true] %s221_s30 }
  0x34   : > { %s2232_s6 = scalar_lea.vmem %s222_s30, 2048  ;;  %p2240_p6 = scmp.lt.s32.totalorder %s222_s30, %s222_s30 }
  0x35   : > { %p2233_p10 = scmp.ne.s32.totalorder %s222_s30, %s2232_s6  ;;  %p2241_p13 = scmp.lt.s32.totalorder %s2232_s6, %s2232_s6 }
  0x37   : > { %p2235_p11 = pnand %p2233_p10, %p2145_p7  ;;  %p2242_p0 = por %p2241_p13, %p2240_p6 }
  0x39   : > { %p2236_p12 = pneg %p2235_p11 }
  0x3b   : > { %p2243_p1 = pnand %p2242_p0, %p2236_p12 }
  0x3d   : > { %2246 = shalt.err (!%p2243_p1)
}
  0x3e   : > { %2017 = dma.hbm_to_vmem [thread:$0]  (!%p2384_p5), %s2795_s3, 2048, %s222_s30, [#allocation11], %s2316_s17, %s2316_s17, %s2317_s24  }
  0x3f   : > { %240 = sbr.rel (%p2376_p3) target bundleno = 1198 (0x4ae), region = 40 }
  0x44   : > { %2284 = dma.done.wait (%p2372_p2), [#allocation5], 1024  }
  0x45   : > { %2286 = vsyncadd (%p2372_p2), [#allocation5], 4294966272 }
  0x46   : > { %2288 = dma.done.wait (%p2372_p2), [#allocation8], 3072  }
  0x47   : > { %2290 = vsyncadd (%p2372_p2), [#allocation8], 4294964224 }
  0x48   : > { %2292 = dma.done.wait (%p2372_p2), [#allocation11], 2048  }
  0x49   : > { %2294 = vsyncadd (%p2372_p2), [#allocation11], 4294965248  ;;  %p273_p3 = scmp.eq.s32.totalorder %s2301_s18, 0 }
  0x4a   : > { %v279_v0 = vld [vmem:[#allocation7] sm:$0xff] (%p273_p3)   ;;  %v281_v1 = vld [vmem:[#allocation7 + $0x8] sm:$0xff] (%p273_p3)   ;;  %v283_v2 = vld [vmem:[#allocation7 + $0x10] sm:$0xff] (%p273_p3)  }
  0x4b   : > { %278 = sbr.rel (!%p273_p3) target bundleno = 80 (0x50), region = 60  ;;  %295 = vst [vmem:[#allocation2] sm:$0xff] (%p273_p3), %v279_v0   ;;  %297 = vst [vmem:[#allocation2 + $0x8] sm:$0xff] (%p273_p3), %v281_v1   ;;  %v285_v3 = vld [vmem:[#allocation7 + $0x18] sm:$0xff] (%p273_p3)   ;;  %v287_v4 = vld [vmem:[#allocation7 + $0x20] sm:$0xff] (%p273_p3)  }
  0x4c   : > { %299 = vst [vmem:[#allocation2 + $0x10] sm:$0xff] (%p273_p3), %v283_v2   ;;  %v289_v5 = vld [vmem:[#allocation7 + $0x28] sm:$0xff] (%p273_p3)   ;;  %301 = vst [vmem:[#allocation2 + $0x18] sm:$0xff] (%p273_p3), %v285_v3   ;;  %v291_v6 = vld [vmem:[#allocation7 + $0x30] sm:$0xff] (%p273_p3)  }
  0x4d   : > { %303 = vst [vmem:[#allocation2 + $0x20] sm:$0xff] (%p273_p3), %v287_v4   ;;  %305 = vst [vmem:[#allocation2 + $0x28] sm:$0xff] (%p273_p3), %v289_v5   ;;  %v293_v7 = vld [vmem:[#allocation7 + $0x38] sm:$0xff] (%p273_p3)  }
  0x4e   : > { %307 = vst [vmem:[#allocation2 + $0x30] sm:$0xff] (%p273_p3), %v291_v6   ;;  %309 = vst [vmem:[#allocation2 + $0x38] sm:$0xff] (%p273_p3), %v293_v7  }
  0x50 PF: > { %v2446_v8 = vld [vmem:[#allocation4] sm:$0xf]  ;;  %v2448_v9 = vld [vmem:[#allocation4 + $0x4] sm:$0xf]  ;;  %v2450_v10 = vld [vmem:[#allocation4 + $0x8] sm:$0xf] }
  0x51   : > { %v2452_v11 = vld [vmem:[#allocation4 + $0xc] sm:$0xf]  ;;  %v2454_v12 = vld [vmem:[#allocation4 + $0x10] sm:$0xf]  ;;  %v2456_v13 = vld [vmem:[#allocation4 + $0x14] sm:$0xf] }
  0x52   : > { %v2458_v14 = vld [vmem:[#allocation4 + $0x18] sm:$0xf]  ;;  %v2460_v15 = vld [vmem:[#allocation4 + $0x1c] sm:$0xf]  ;;  %v2462_v16 = vld [vmem:[#allocation4 + $0x20] sm:$0xf] }
  0x53   : > { %v2464_v17 = vld [vmem:[#allocation4 + $0x24] sm:$0xf]  ;;  %v2466_v18 = vld [vmem:[#allocation4 + $0x28] sm:$0xf]  ;;  %v2468_v19 = vld [vmem:[#allocation4 + $0x2c] sm:$0xf] }
  0x54   : > { %v2470_v20 = vld [vmem:[#allocation4 + $0x30] sm:$0xf]  ;;  %v2472_v21 = vld [vmem:[#allocation4 + $0x34] sm:$0xf]  ;;  %v2474_v22 = vld [vmem:[#allocation4 + $0x38] sm:$0xf] }
  0x55   : > { %v2476_v23 = vld [vmem:[#allocation4 + $0x3c] sm:$0xf]  ;;  %v2478_v24 = vld [vmem:[#allocation9] sm:$0xff]  ;;  %v2480_v25 = vld [vmem:[#allocation9 + $0x8] sm:$0xff]  ;;  %p344_p2 = scmp.lt.s32.totalorder %s2301_s18, 0  ;;  %s345_s22 = ssub.s32 0, %s2301_s18 }
  0x56   : > { %v2484_v26 = vld [vmem:[#allocation9 + $0x10] sm:$0xff]  ;;  %v2486_v27 = vld [vmem:[#allocation9 + $0x18] sm:$0xff]  ;;  %v2488_v28 = vld [vmem:[#allocation9 + $0x20] sm:$0xff]  ;;  %s1496_s23 = smin.u32 %s2301_s18, %s345_s22 }
  0x57   : > { %v2491_v29 = vld [vmem:[#allocation9 + $0x28] sm:$0xff]  ;;  %v2493_v30 = vld [vmem:[#allocation9 + $0x30] sm:$0xff]  ;;  %v2495_v31 = vld [vmem:[#allocation9 + $0x38] sm:$0xff]  ;;  %s347_s26 = sand.u32 1, %s1496_s23  }
  0x58   : > { %v2497_v32 = vld [vmem:[#allocation9 + $0x40] sm:$0xff]  ;;  %v2499_v33 = vld [vmem:[#allocation9 + $0x48] sm:$0xff]  ;;  %v2501_v34 = vld [vmem:[#allocation9 + $0x50] sm:$0xff]  ;;  %s348_s9 = ssub.s32 0, %s347_s26 }
  0x59   : > { %v2503_v35 = vld [vmem:[#allocation9 + $0x58] sm:$0xff]  ;;  %v2505_v36 = vld [vmem:[#allocation9 + $0x60] sm:$0xff]  ;;  %v2507_v37 = vld [vmem:[#allocation9 + $0x68] sm:$0xff]  ;;  %s2808_s9 = smov (!%p344_p2, %s348_s9), %s347_s26 }
  0x5a   : > { %v2511_v38 = vld [vmem:[#allocation9 + $0x70] sm:$0xff]  ;;  %v2513_v39 = vld [vmem:[#allocation9 + $0x78] sm:$0xff]  ;;  %p1498_p5 = scmp.lt.s32.totalorder %s2808_s9, 0  ;;  %s354_s10 = sadd.s32 2, %s2808_s9 }
  0x5c   : > { %s2810_s10 = smov (!%p1498_p5, %s354_s10), %s2808_s9 }
  0x5d   : > { %p1499_p7 = scmp.ne.s32.totalorder %s2810_s10, 0 }
  0x5f   : > { %359 = sbr.rel (%p1499_p7) target bundleno = 345 (0x159), region = 64 }
  0x64   : > { %v2063_v40 = vld [vmem:[#allocation2 + $0x38] sm:$0xff]   ;;  %v2064_v41 = vld [vmem:[#allocation2 + $0x30] sm:$0xff]   ;;  %v1500_v42 = vcombine.low %v2446_v8, %v2448_v9  ;;  %v1504_v43 = vcombine.low %v2462_v16, %v2464_v17  ;;  %v2065_v44 = vld [vmem:[#allocation2 + $0x28] sm:$0xff]   ;;  %v1501_v50 = vcombine.low %v2450_v10, %v2452_v11  ;;  %v1505_v51 = vcombine.low %v2466_v18, %v2468_v19 }
  0x65   : > { %1801 = vmatprep.subr.bf16.mxu0 %v2063_v40  ;;  %1921 = vmatprep.subr.bf16.mxu1 %v2063_v40  ;;  %v2066_v45 = vld [vmem:[#allocation2 + $0x20] sm:$0xff]   ;;  %v2067_v46 = vld [vmem:[#allocation2 + $0x18] sm:$0xff]   ;;  %v2068_v47 = vld [vmem:[#allocation2 + $0x10] sm:$0xff]   ;;  %v1502_v52 = vcombine.low %v2454_v12, %v2456_v13  ;;  %v1506_v53 = vcombine.low %v2470_v20, %v2472_v21  ;;  %v1503_v54 = vcombine.low %v2458_v14, %v2460_v15 }
  0x66   : > { %1802 = vmatpush3.bf16.msra.mxu0 %v2063_v40  ;;  %1929 = vmatpush3.bf16.msra.mxu1 %v2063_v40  ;;  %v2069_v48 = vld [vmem:[#allocation2 + $0x8] sm:$0xff]   ;;  %v2070_v49 = vld [vmem:[#allocation2] sm:$0xff]   ;;  %v1507_v55 = vcombine.low %v2474_v22, %v2476_v23 }
  0x67   : > { %1803 = vmatprep.subr.bf16.mxu0 %v2064_v41  ;;  %1922 = vmatprep.subr.bf16.mxu1 %v2064_v41 }
  0x68   : > { %1817 = vmatprep.mubr.bf16.mxu0 %v1500_v42  ;;  %1825 = vmatprep.mubr.bf16.mxu1 %v1504_v43 }
  0x6a   : > { %1804 = vmatpush3.bf16.msra.mxu0 %v2064_v41  ;;  %1930 = vmatpush3.bf16.msra.mxu1 %v2064_v41 }
  0x6b   : > { %1805 = vmatprep.subr.bf16.mxu0 %v2065_v44  ;;  %1923 = vmatprep.subr.bf16.mxu1 %v2065_v44 }
  0x6e   : > { %1806 = vmatpush3.bf16.msra.mxu0 %v2065_v44  ;;  %1931 = vmatpush3.bf16.msra.mxu1 %v2065_v44 }
  0x6f   : > { %1807 = vmatprep.subr.bf16.mxu0 %v2066_v45  ;;  %1924 = vmatprep.subr.bf16.mxu1 %v2066_v45 }
  0x72   : > { %1808 = vmatpush3.bf16.msra.mxu0 %v2066_v45  ;;  %1932 = vmatpush3.bf16.msra.mxu1 %v2066_v45 }
  0x73   : > { %1809 = vmatprep.subr.bf16.mxu0 %v2067_v46  ;;  %1925 = vmatprep.subr.bf16.mxu1 %v2067_v46 }
  0x76   : > { %1810 = vmatpush3.bf16.msra.mxu0 %v2067_v46  ;;  %1933 = vmatpush3.bf16.msra.mxu1 %v2067_v46 }
  0x77   : > { %1811 = vmatprep.subr.bf16.mxu0 %v2068_v47  ;;  %1926 = vmatprep.subr.bf16.mxu1 %v2068_v47 }
  0x7a   : > { %1812 = vmatpush3.bf16.msra.mxu0 %v2068_v47  ;;  %1934 = vmatpush3.bf16.msra.mxu1 %v2068_v47 }
  0x7b   : > { %1813 = vmatprep.subr.bf16.mxu0 %v2069_v48  ;;  %1927 = vmatprep.subr.bf16.mxu1 %v2069_v48 }
  0x7e   : > { %1814 = vmatpush3.bf16.msra.mxu0 %v2069_v48  ;;  %1935 = vmatpush3.bf16.msra.mxu1 %v2069_v48 }
  0x7f   : > { %1815 = vmatprep.subr.bf16.mxu0 %v2070_v49  ;;  %1928 = vmatprep.subr.bf16.mxu1 %v2070_v49 }
  0x82   : > { %1816 = vmatpush3.bf16.msra.mxu0 %v2070_v49  ;;  %1936 = vmatpush3.bf16.msra.mxu1 %v2070_v49 }
  0x85   : > { %1818 = vmatmul.mubr.bf16.vlgmr.msra.gmra.mxu0 %v1501_v50  ;;  %1826 = vmatmul.mubr.bf16.vlgmr.msra.gmra.mxu1 %v1505_v51 }
  0x86   : > { %1821 = vmatprep.mubr.bf16.mxu0 %v1502_v52  ;;  %1829 = vmatprep.mubr.bf16.mxu1 %v1506_v53 }
  0x8d   : > { %1822 = vmatmul.mubr.bf16.gmra.mxu0 %v1503_v54  ;;  %1830 = vmatmul.mubr.bf16.gmra.mxu1 %v1507_v55 }
 0x145   : > { %v1819_v56 = vpop.f32.mrf.mxu0  ;;  %v1827_v57 = vpop.f32.mrf.mxu1 }
 0x146   : > { %v515_v62 = vadd.f32 %v1819_v56, %v2484_v26  ;;  %v547_v63 = vadd.f32 %v1827_v57, %v2501_v34 }
 0x147   : > { %v506_v58 = vpop.f32.mrf.mxu0  ;;  %v538_v59 = vpop.f32.mrf.mxu1 }
 0x148   : > { %v507_v2 = vadd.f32 %v506_v58, %v2478_v24  ;;  %v539_v3 = vadd.f32 %v538_v59, %v2497_v32 }
 0x149   : > { %v1820_v60 = vpop.f32.mrf.mxu0  ;;  %v1828_v61 = vpop.f32.mrf.mxu1 }
 0x14a   : > { %v518_v0 = vadd.f32 %v1820_v60, %v2486_v27  ;;  %v550_v1 = vadd.f32 %v1828_v61, %v2503_v35 }
 0x14b   : > { %v509_v4 = vpop.f32.mrf.mxu0  ;;  %v541_v5 = vpop.f32.mrf.mxu1 }
 0x14c   : > { %v1612_v6 = vpack.c.bf16 %v518_v0, %v515_v62  ;;  %v1632_v7 = vpack.c.bf16 %v550_v1, %v547_v63  ;;  %v510_v40 = vadd.f32 %v509_v4, %v2480_v25  ;;  %v542_v41 = vadd.f32 %v541_v5, %v2499_v33 }
 0x14d   : > { %v1823_v42 = vpop.f32.mrf.mxu0  ;;  %v1831_v43 = vpop.f32.mrf.mxu1 }
 0x14e   : > { %1716 = vst [vmem:[#allocation3 + $0x8] sm:$0xff] %v1612_v6   ;;  %1720 = vst [vmem:[#allocation3 + $0x28] sm:$0xff] %v1632_v7   ;;  %v1607_v44 = vpack.c.bf16 %v510_v40, %v507_v2  ;;  %v1627_v45 = vpack.c.bf16 %v542_v41, %v539_v3  ;;  %v531_v50 = vadd.f32 %v1823_v42, %v2493_v30 }
 0x14f   : > { %v522_v46 = vpop.f32.mrf.mxu0  ;;  %v554_v47 = vpop.f32.mrf.mxu1  ;;  %v563_v51 = vadd.f32 %v1831_v43, %v2511_v38 }
 0x150   : > { %1608 = vst [vmem:[#allocation3] sm:$0xff] %v1607_v44   ;;  %1719 = vst [vmem:[#allocation3 + $0x20] sm:$0xff] %v1627_v45   ;;  %v523_v54 = vadd.f32 %v522_v46, %v2488_v28  ;;  %v555_v55 = vadd.f32 %v554_v47, %v2505_v36 }
 0x151   : > { %v1824_v48 = vpop.f32.mrf.mxu0  ;;  %v1832_v49 = vpop.f32.mrf.mxu1 }
 0x152   : > { %v534_v52 = vadd.f32 %v1824_v48, %v2495_v31  ;;  %v566_v53 = vadd.f32 %v1832_v49, %v2513_v39 }
 0x153   : > { %v525_v56 = vpop.f32.mrf.mxu0  ;;  %v557_v57 = vpop.f32.mrf.mxu1 }
 0x154   : > { %v1622_v58 = vpack.c.bf16 %v534_v52, %v531_v50  ;;  %v1642_v59 = vpack.c.bf16 %v566_v53, %v563_v51  ;;  %v526_v60 = vadd.f32 %v525_v56, %v2491_v29  ;;  %v558_v61 = vadd.f32 %v557_v57, %v2507_v37 }
 0x156   : > { %1718 = vst [vmem:[#allocation3 + $0x18] sm:$0xff] %v1622_v58   ;;  %1722 = vst [vmem:[#allocation3 + $0x38] sm:$0xff] %v1642_v59   ;;  %v1617_v62 = vpack.c.bf16 %v526_v60, %v523_v54  ;;  %v1637_v63 = vpack.c.bf16 %v558_v61, %v555_v55 }
 0x158   : > { %1717 = vst [vmem:[#allocation3 + $0x10] sm:$0xff] %v1617_v62   ;;  %1721 = vst [vmem:[#allocation3 + $0x30] sm:$0xff] %v1637_v63  }
 0x159 PF: > { %p1532_p4 = scmp.ne.s32.totalorder %s2810_s10, 1 }
 0x15b   : > { %656 = sbr.rel (%p1532_p4) target bundleno = 597 (0x255), region = 68 }
 0x160   : > { %v2071_v0 = vld [vmem:[#allocation3 + $0x38] sm:$0xff]   ;;  %v2072_v1 = vld [vmem:[#allocation3 + $0x30] sm:$0xff]   ;;  %v1533_v2 = vcombine.low %v2446_v8, %v2448_v9  ;;  %v1537_v3 = vcombine.low %v2462_v16, %v2464_v17  ;;  %v2073_v4 = vld [vmem:[#allocation3 + $0x28] sm:$0xff]   ;;  %v1534_v6 = vcombine.low %v2450_v10, %v2452_v11  ;;  %v1538_v7 = vcombine.low %v2466_v18, %v2468_v19 }
 0x161   : > { %1833 = vmatprep.subr.bf16.mxu0 %v2071_v0  ;;  %1937 = vmatprep.subr.bf16.mxu1 %v2071_v0  ;;  %v2074_v5 = vld [vmem:[#allocation3 + $0x20] sm:$0xff]   ;;  %v2075_v8 = vld [vmem:[#allocation3 + $0x18] sm:$0xff]   ;;  %v2076_v9 = vld [vmem:[#allocation3 + $0x10] sm:$0xff]   ;;  %v1535_v40 = vcombine.low %v2454_v12, %v2456_v13  ;;  %v1539_v41 = vcombine.low %v2470_v20, %v2472_v21  ;;  %v1536_v42 = vcombine.low %v2458_v14, %v2460_v15 }
 0x162   : > { %1834 = vmatpush3.bf16.msra.mxu0 %v2071_v0  ;;  %1945 = vmatpush3.bf16.msra.mxu1 %v2071_v0  ;;  %v2077_v16 = vld [vmem:[#allocation3 + $0x8] sm:$0xff]   ;;  %v2078_v17 = vld [vmem:[#allocation3] sm:$0xff]   ;;  %v1540_v10 = vcombine.low %v2474_v22, %v2476_v23 }
 0x163   : > { %1835 = vmatprep.subr.bf16.mxu0 %v2072_v1  ;;  %1938 = vmatprep.subr.bf16.mxu1 %v2072_v1 }
 0x164   : > { %1849 = vmatprep.mubr.bf16.mxu0 %v1533_v2  ;;  %1857 = vmatprep.mubr.bf16.mxu1 %v1537_v3 }
 0x166   : > { %1836 = vmatpush3.bf16.msra.mxu0 %v2072_v1  ;;  %1946 = vmatpush3.bf16.msra.mxu1 %v2072_v1 }
 0x167   : > { %1837 = vmatprep.subr.bf16.mxu0 %v2073_v4  ;;  %1939 = vmatprep.subr.bf16.mxu1 %v2073_v4 }
 0x16a   : > { %1838 = vmatpush3.bf16.msra.mxu0 %v2073_v4  ;;  %1947 = vmatpush3.bf16.msra.mxu1 %v2073_v4 }
 0x16b   : > { %1839 = vmatprep.subr.bf16.mxu0 %v2074_v5  ;;  %1940 = vmatprep.subr.bf16.mxu1 %v2074_v5 }
 0x16e   : > { %1840 = vmatpush3.bf16.msra.mxu0 %v2074_v5  ;;  %1948 = vmatpush3.bf16.msra.mxu1 %v2074_v5 }
 0x16f   : > { %1841 = vmatprep.subr.bf16.mxu0 %v2075_v8  ;;  %1941 = vmatprep.subr.bf16.mxu1 %v2075_v8 }
 0x172   : > { %1842 = vmatpush3.bf16.msra.mxu0 %v2075_v8  ;;  %1949 = vmatpush3.bf16.msra.mxu1 %v2075_v8 }
 0x173   : > { %1843 = vmatprep.subr.bf16.mxu0 %v2076_v9  ;;  %1942 = vmatprep.subr.bf16.mxu1 %v2076_v9 }
 0x176   : > { %1844 = vmatpush3.bf16.msra.mxu0 %v2076_v9  ;;  %1950 = vmatpush3.bf16.msra.mxu1 %v2076_v9 }
 0x177   : > { %1845 = vmatprep.subr.bf16.mxu0 %v2077_v16  ;;  %1943 = vmatprep.subr.bf16.mxu1 %v2077_v16 }
 0x17a   : > { %1846 = vmatpush3.bf16.msra.mxu0 %v2077_v16  ;;  %1951 = vmatpush3.bf16.msra.mxu1 %v2077_v16 }
 0x17b   : > { %1847 = vmatprep.subr.bf16.mxu0 %v2078_v17  ;;  %1944 = vmatprep.subr.bf16.mxu1 %v2078_v17 }
 0x17e   : > { %1848 = vmatpush3.bf16.msra.mxu0 %v2078_v17  ;;  %1952 = vmatpush3.bf16.msra.mxu1 %v2078_v17 }
 0x181   : > { %1850 = vmatmul.mubr.bf16.vlgmr.msra.gmra.mxu0 %v1534_v6  ;;  %1858 = vmatmul.mubr.bf16.vlgmr.msra.gmra.mxu1 %v1538_v7 }
 0x182   : > { %1853 = vmatprep.mubr.bf16.mxu0 %v1535_v40  ;;  %1861 = vmatprep.mubr.bf16.mxu1 %v1539_v41 }
 0x189   : > { %1854 = vmatmul.mubr.bf16.gmra.mxu0 %v1536_v42  ;;  %1862 = vmatmul.mubr.bf16.gmra.mxu1 %v1540_v10 }
 0x241   : > { %v1851_v11 = vpop.f32.mrf.mxu0  ;;  %v1859_v18 = vpop.f32.mrf.mxu1 }
 0x242   : > { %v812_v20 = vadd.f32 %v1851_v11, %v2484_v26  ;;  %v844_v21 = vadd.f32 %v1859_v18, %v2501_v34 }
 0x243   : > { %v803_v19 = vpop.f32.mrf.mxu0  ;;  %v835_v43 = vpop.f32.mrf.mxu1 }
 0x244   : > { %v804_v14 = vadd.f32 %v803_v19, %v2478_v24  ;;  %v836_v15 = vadd.f32 %v835_v43, %v2497_v32 }
 0x245   : > { %v1852_v12 = vpop.f32.mrf.mxu0  ;;  %v1860_v13 = vpop.f32.mrf.mxu1 }
 0x246   : > { %v815_v44 = vadd.f32 %v1852_v12, %v2486_v27  ;;  %v847_v45 = vadd.f32 %v1860_v13, %v2503_v35 }
 0x247   : > { %v806_v22 = vpop.f32.mrf.mxu0  ;;  %v838_v23 = vpop.f32.mrf.mxu1 }
 0x248   : > { %v1652_v46 = vpack.c.bf16 %v815_v44, %v812_v20  ;;  %v1672_v47 = vpack.c.bf16 %v847_v45, %v844_v21  ;;  %v807_v48 = vadd.f32 %v806_v22, %v2480_v25  ;;  %v839_v49 = vadd.f32 %v838_v23, %v2499_v33 }
 0x249   : > { %v1855_v50 = vpop.f32.mrf.mxu0  ;;  %v1863_v26 = vpop.f32.mrf.mxu1 }
 0x24a   : > { %1723 = vst [vmem:[#allocation2 + $0x8] sm:$0xff] %v1652_v46   ;;  %1727 = vst [vmem:[#allocation2 + $0x28] sm:$0xff] %v1672_v47   ;;  %v1647_v34 = vpack.c.bf16 %v807_v48, %v804_v14  ;;  %v1667_v27 = vpack.c.bf16 %v839_v49, %v836_v15  ;;  %v828_v52 = vadd.f32 %v1855_v50, %v2493_v30 }
 0x24b   : > { %v819_v51 = vpop.f32.mrf.mxu0  ;;  %v851_v35 = vpop.f32.mrf.mxu1  ;;  %v860_v53 = vadd.f32 %v1863_v26, %v2511_v38 }
 0x24c   : > { %1648 = vst [vmem:[#allocation2] sm:$0xff] %v1647_v34   ;;  %1726 = vst [vmem:[#allocation2 + $0x20] sm:$0xff] %v1667_v27   ;;  %v820_v54 = vadd.f32 %v819_v51, %v2488_v28  ;;  %v852_v55 = vadd.f32 %v851_v35, %v2505_v36 }
 0x24d   : > { %v1856_v24 = vpop.f32.mrf.mxu0  ;;  %v1864_v32 = vpop.f32.mrf.mxu1 }
 0x24e   : > { %v831_v25 = vadd.f32 %v1856_v24, %v2495_v31  ;;  %v863_v33 = vadd.f32 %v1864_v32, %v2513_v39 }
 0x24f   : > { %v822_v56 = vpop.f32.mrf.mxu0  ;;  %v854_v57 = vpop.f32.mrf.mxu1 }
 0x250   : > { %v1662_v58 = vpack.c.bf16 %v831_v25, %v828_v52  ;;  %v1682_v59 = vpack.c.bf16 %v863_v33, %v860_v53  ;;  %v823_v60 = vadd.f32 %v822_v56, %v2491_v29  ;;  %v855_v61 = vadd.f32 %v854_v57, %v2507_v37 }
 0x252   : > { %1725 = vst [vmem:[#allocation2 + $0x18] sm:$0xff] %v1662_v58   ;;  %1729 = vst [vmem:[#allocation2 + $0x38] sm:$0xff] %v1682_v59   ;;  %v1657_v30 = vpack.c.bf16 %v823_v60, %v820_v54  ;;  %v1677_v38 = vpack.c.bf16 %v855_v61, %v852_v55 }
 0x254   : > { %1724 = vst [vmem:[#allocation2 + $0x10] sm:$0xff] %v1657_v30   ;;  %1728 = vst [vmem:[#allocation2 + $0x30] sm:$0xff] %v1677_v38  }
 0x255 PF: > { %p1565_p8 = scmp.ne.s32.totalorder %s2301_s18, 9 }
 0x257   : > { %953 = sbr.rel (%p1565_p8) target bundleno = 1182 (0x49e), region = 72 }
 0x25c   : > { %v1021_v28 = vld [vmem:[#allocation10 + $0x78] sm:$0xff]  ;;  %v1020_v31 = vld [vmem:[#allocation10 + $0x70] sm:$0xff]  ;;  %v1019_v36 = vld [vmem:[#allocation10 + $0x68] sm:$0xff]  ;;  %v1174_v56 = vlaneseq }
 0x25d   : > { %1865 = vmatprep.subr.mxu0 %v1021_v28  ;;  %1953 = vmatprep.subr.mxu1 %v1021_v28  ;;  %v1018_v29 = vld [vmem:[#allocation10 + $0x60] sm:$0xff]  ;;  %v1017_v37 = vld [vmem:[#allocation10 + $0x58] sm:$0xff]  ;;  %v1016_v39 = vld [vmem:[#allocation10 + $0x50] sm:$0xff] }
 0x25e   : > { %1866 = vmatpush3.msra.mxu0 %v1021_v28  ;;  %1969 = vmatpush3.msra.mxu1 %v1021_v28  ;;  %v1015_v62 = vld [vmem:[#allocation10 + $0x48] sm:$0xff]  ;;  %v1014_v63 = vld [vmem:[#allocation10 + $0x40] sm:$0xff]  ;;  %v1013_v0 = vld [vmem:[#allocation10 + $0x38] sm:$0xff]  ;;  %v2584_v57 = vand.u32 127, %v1174_v56 }
 0x25f   : > { %1867 = vmatprep.subr.mxu0 %v1020_v31  ;;  %1954 = vmatprep.subr.mxu1 %v1020_v31  ;;  %v1012_v1 = vld [vmem:[#allocation10 + $0x30] sm:$0xff]  ;;  %v1011_v2 = vld [vmem:[#allocation10 + $0x28] sm:$0xff]  ;;  %v1010_v3 = vld [vmem:[#allocation10 + $0x20] sm:$0xff] }
 0x260   : > { %1868 = vmatpush3.msra.mxu0 %v1020_v31  ;;  %1970 = vmatpush3.msra.mxu1 %v1020_v31  ;;  %v1009_v4 = vld [vmem:[#allocation10 + $0x18] sm:$0xff]  ;;  %v1685_v5 = vld [vmem:[#allocation2] sm:$0xff]   ;;  %v1008_v9 = vld [vmem:[#allocation10 + $0x10] sm:$0xff]  ;;  %vm1176_vm0 = vcmp.lt.s32.totalorder %v2584_v57, 8 }
 0x261   : > { %1869 = vmatprep.subr.mxu0 %v1019_v36  ;;  %1955 = vmatprep.subr.mxu1 %v1019_v36  ;;  %v1733_v8 = vld [vmem:[#allocation2 + $0x20] sm:$0xff]   ;;  %v1730_v16 = vld [vmem:[#allocation2 + $0x8] sm:$0xff]   ;;  %v1686_v6 = vunpack.c.l.bf16 %v1685_v5  ;;  %v1687_v41 = vunpack.c.h.bf16 %v1685_v5  ;;  %v1731_v19 = vld [vmem:[#allocation2 + $0x10] sm:$0xff]  }
 0x262   : > { %1870 = vmatpush3.msra.mxu0 %v1019_v36  ;;  %1971 = vmatpush3.msra.mxu1 %v1019_v36  ;;  %v1734_v17 = vld [vmem:[#allocation2 + $0x28] sm:$0xff]   ;;  %v1702_v7 = vunpack.c.l.bf16 %v1733_v8  ;;  %v1703_v42 = vunpack.c.h.bf16 %v1733_v8  ;;  %v1690_v10 = vunpack.c.l.bf16 %v1730_v16  ;;  %v1006_v18 = vld [vmem:[#allocation10] sm:$0xff]  ;;  %v1735_v43 = vld [vmem:[#allocation2 + $0x30] sm:$0xff]   ;;  %v1691_v44 = vunpack.c.h.bf16 %v1730_v16 }
 0x263   : > { %1871 = vmatprep.subr.mxu0 %v1018_v29  ;;  %1956 = vmatprep.subr.mxu1 %v1018_v29  ;;  %v1007_v40 = vld [vmem:[#allocation10 + $0x8] sm:$0xff]  ;;  %v1706_v11 = vunpack.c.l.bf16 %v1734_v17  ;;  %v990_v12 = vmax.f32 %v1686_v6, 0.0  ;;  %v991_v20 = vmax.f32 %v1687_v41, 0.0  ;;  %v1707_v45 = vunpack.c.h.bf16 %v1734_v17  ;;  %v1732_v46 = vld [vmem:[#allocation2 + $0x18] sm:$0xff]   ;;  %v1566_v58 = vld [vmem:[%s2796_s4] ss:$0 sm:$0xff] }
 0x264   : > { %1872 = vmatpush3.msra.mxu0 %v1018_v29  ;;  %1972 = vmatpush3.msra.mxu1 %v1018_v29  ;;  %v998_v13 = vmax.f32 %v1702_v7, 0.0  ;;  %v999_v21 = vmax.f32 %v1703_v42, 0.0  ;;  %v992_v14 = vmax.f32 %v1690_v10, 0.0  ;;  %v1694_v22 = vunpack.c.l.bf16 %v1731_v19  ;;  %v1736_v47 = vld [vmem:[#allocation2 + $0x38] sm:$0xff]  }
 0x265   : > { %1873 = vmatprep.subr.mxu0 %v1017_v37  ;;  %1957 = vmatprep.subr.mxu1 %v1017_v37  ;;  %v1000_v15 = vmax.f32 %v1706_v11, 0.0  ;;  %v1710_v23 = vunpack.c.l.bf16 %v1735_v43  ;;  %v993_v48 = vmax.f32 %v1691_v44, 0.0  ;;  %v1001_v49 = vmax.f32 %v1707_v45, 0.0 }
 0x266   : > { %1874 = vmatpush3.msra.mxu0 %v1017_v37  ;;  %1973 = vmatpush3.msra.mxu1 %v1017_v37  ;;  %v1695_v50 = vunpack.c.h.bf16 %v1731_v19  ;;  %v1711_v26 = vunpack.c.h.bf16 %v1735_v43  ;;  %v994_v34 = vmax.f32 %v1694_v22, 0.0  ;;  %v1698_v51 = vunpack.c.l.bf16 %v1732_v46 }
 0x267   : > { %1875 = vmatprep.subr.mxu0 %v1016_v39  ;;  %1958 = vmatprep.subr.mxu1 %v1016_v39  ;;  %v1002_v27 = vmax.f32 %v1710_v23, 0.0  ;;  %v1714_v35 = vunpack.c.l.bf16 %v1736_v47  ;;  %v1699_v52 = vunpack.c.h.bf16 %v1732_v46  ;;  %v1715_v53 = vunpack.c.h.bf16 %v1736_v47 }
 0x268   : > { %1876 = vmatpush3.msra.mxu0 %v1016_v39  ;;  %1974 = vmatpush3.msra.mxu1 %v1016_v39  ;;  %v995_v24 = vmax.f32 %v1695_v50, 0.0  ;;  %v1003_v32 = vmax.f32 %v1711_v26, 0.0  ;;  %v996_v25 = vmax.f32 %v1698_v51, 0.0 }
 0x269   : > { %1877 = vmatprep.subr.mxu0 %v1015_v62  ;;  %1959 = vmatprep.subr.mxu1 %v1015_v62  ;;  %v1004_v33 = vmax.f32 %v1714_v35, 0.0  ;;  %v997_v54 = vmax.f32 %v1699_v52, 0.0  ;;  %v1005_v55 = vmax.f32 %v1715_v53, 0.0 }
 0x26a   : > { %1878 = vmatpush3.msra.mxu0 %v1015_v62  ;;  %1975 = vmatpush3.msra.mxu1 %v1015_v62 }
 0x26b   : > { %1879 = vmatprep.subr.mxu0 %v1014_v63  ;;  %1960 = vmatprep.subr.mxu1 %v1014_v63 }
 0x26c   : > { %1880 = vmatpush3.msra.mxu0 %v1014_v63  ;;  %1976 = vmatpush3.msra.mxu1 %v1014_v63 }
 0x26d   : > { %1881 = vmatprep.subr.mxu0 %v1013_v0  ;;  %1961 = vmatprep.subr.mxu1 %v1013_v0 }
 0x26e   : > { %1882 = vmatpush3.msra.mxu0 %v1013_v0  ;;  %1977 = vmatpush3.msra.mxu1 %v1013_v0 }
 0x26f   : > { %1883 = vmatprep.subr.mxu0 %v1012_v1  ;;  %1962 = vmatprep.subr.mxu1 %v1012_v1 }
 0x270   : > { %1884 = vmatpush3.msra.mxu0 %v1012_v1  ;;  %1978 = vmatpush3.msra.mxu1 %v1012_v1 }
 0x271   : > { %1885 = vmatprep.subr.mxu0 %v1011_v2  ;;  %1963 = vmatprep.subr.mxu1 %v1011_v2 }
 0x272   : > { %1886 = vmatpush3.msra.mxu0 %v1011_v2  ;;  %1979 = vmatpush3.msra.mxu1 %v1011_v2 }
 0x273   : > { %1887 = vmatprep.subr.mxu0 %v1010_v3  ;;  %1964 = vmatprep.subr.mxu1 %v1010_v3 }
 0x274   : > { %1888 = vmatpush3.msra.mxu0 %v1010_v3  ;;  %1980 = vmatpush3.msra.mxu1 %v1010_v3 }
 0x275   : > { %1889 = vmatprep.subr.mxu0 %v1009_v4  ;;  %1965 = vmatprep.subr.mxu1 %v1009_v4 }
 0x276   : > { %1890 = vmatpush3.msra.mxu0 %v1009_v4  ;;  %1981 = vmatpush3.msra.mxu1 %v1009_v4 }
 0x277   : > { %1891 = vmatprep.subr.mxu0 %v1008_v9  ;;  %1966 = vmatprep.subr.mxu1 %v1008_v9 }
 0x278   : > { %1892 = vmatpush3.msra.mxu0 %v1008_v9  ;;  %1982 = vmatpush3.msra.mxu1 %v1008_v9 }
 0x279   : > { %1893 = vmatprep.subr.mxu0 %v1007_v40  ;;  %1967 = vmatprep.subr.mxu1 %v1007_v40 }
 0x27a   : > { %1894 = vmatpush3.msra.mxu0 %v1007_v40  ;;  %1983 = vmatpush3.msra.mxu1 %v1007_v40 }
 0x27b   : > { %1895 = vmatprep.subr.mxu0 %v1006_v18  ;;  %1968 = vmatprep.subr.mxu1 %v1006_v18 }
 0x27c   : > { %1896 = vmatpush3.msra.mxu0 %v1006_v18  ;;  %1984 = vmatpush3.msra.mxu1 %v1006_v18 }
 0x27d   : > { %1897 = vmatprep.mubr.f32.mxu0 %v990_v12  ;;  %1909 = vmatprep.mubr.f32.mxu1 %v998_v13 }
 0x27e   : > { %1898 = vmatmul.mubr.f32.vlgmr.msra.gmra.mxu0 %v991_v20  ;;  %1910 = vmatmul.mubr.f32.vlgmr.msra.gmra.mxu1 %v999_v21 }
 0x27f   : > { %1900 = vmatprep.mubr.f32.mxu0 %v992_v14  ;;  %1912 = vmatprep.mubr.f32.mxu1 %v1000_v15 }
 0x282   : > { %1901 = vmatmul.mubr.f32.gmra.mxu0 %v993_v48  ;;  %1913 = vmatmul.mubr.f32.gmra.mxu1 %v1001_v49 }
 0x283   : > { %1903 = vmatprep.mubr.f32.mxu0 %v994_v34  ;;  %1915 = vmatprep.mubr.f32.mxu1 %v1002_v27 }
 0x286   : > { %1904 = vmatmul.mubr.f32.gmra.mxu0 %v995_v24  ;;  %1916 = vmatmul.mubr.f32.gmra.mxu1 %v1003_v32 }
 0x287   : > { %1906 = vmatprep.mubr.f32.mxu0 %v996_v25  ;;  %1918 = vmatprep.mubr.f32.mxu1 %v1004_v33 }
 0x28a   : > { %1907 = vmatmul.mubr.f32.gmra.mxu0 %v997_v54  ;;  %1919 = vmatmul.mubr.f32.gmra.mxu1 %v1005_v55 }
 0x33e   : > { %v1899_v59 = vpop.f32.mrf.mxu0  ;;  %v1911_v60 = vpop.f32.mrf.mxu1 }
 0x33f   : > { %v1101_v61 = vadd.f32 %v1899_v59, %v1566_v58  ;;  %v1141_v30 = vadd.f32 %v1911_v60, %v1566_v58 }
 0x340   : > { %v1095_v38 = vpop.f32.mrf.mxu0  ;;  %v1135_v28 = vpop.f32.mrf.mxu1 }
 0x341   : > { %v1096_v31 = vadd.f32 %v1566_v58, %v1095_v38  ;;  %v2592_v36 = vsel %vm1176_vm0, %v1141_v30, -1e+30  ;;  %v2596_v29 = vsel %vm1176_vm0, %v1101_v61, -1e+30  ;;  %v1136_v1 = vadd.f32 %v1566_v58, %v1135_v28 }
 0x342   : > { %1211 = vmax.xlane.f32.xlu1 %v2592_v36  ;;  %1195 = vmax.xlane.f32.xlu0 %v2596_v29  ;;  %v1902_v37 = vpop.f32.mrf.mxu0  ;;  %v1914_v39 = vpop.f32.mrf.mxu1 }
 0x343   : > { %v1111_v62 = vadd.f32 %v1902_v37, %v1566_v58  ;;  %v1151_v63 = vadd.f32 %v1914_v39, %v1566_v58  ;;  %v2606_v3 = vsel %vm1176_vm0, %v1096_v31, -1e+30  ;;  %v2616_v7 = vsel %vm1176_vm0, %v1136_v1, -1e+30 }
 0x344   : > { %v1105_v0 = vpop.f32.mrf.mxu0  ;;  %v1145_v4 = vpop.f32.mrf.mxu1 }
 0x345   : > { %v2602_v2 = vsel %vm1176_vm0, %v1111_v62, -1e+30  ;;  %v2612_v8 = vsel %vm1176_vm0, %v1151_v63, -1e+30  ;;  %v1106_v17 = vadd.f32 %v1566_v58, %v1105_v0  ;;  %v1146_v6 = vadd.f32 %v1566_v58, %v1145_v4 }
 0x346   : > { %1199 = vmax.xlane.f32.xlu1 %v2602_v2  ;;  %1193 = vmax.xlane.f32.xlu0 %v2606_v3  ;;  %v1905_v5 = vpop.f32.mrf.mxu0  ;;  %v1917_v16 = vpop.f32.mrf.mxu1 }
 0x347   : > { %v1121_v40 = vadd.f32 %v1905_v5, %v1566_v58  ;;  %v2622_v11 = vsel %vm1176_vm0, %v1106_v17, -1e+30  ;;  %v2626_v18 = vsel %vm1176_vm0, %v1146_v6, -1e+30  ;;  %v1161_v19 = vadd.f32 %v1917_v16, %v1566_v58 }
 0x348   : > { %v1115_v9 = vpop.f32.mrf.mxu0  ;;  %v1155_v42 = vpop.f32.mrf.mxu1 }
 0x349   : > { %v1116_v41 = vadd.f32 %v1566_v58, %v1115_v9  ;;  %v1156_v43 = vadd.f32 %v1566_v58, %v1155_v42  ;;  %v2632_v12 = vsel %vm1176_vm0, %v1121_v40, -1e+30  ;;  %v2642_v14 = vsel %vm1176_vm0, %v1161_v19, -1e+30 }
 0x34a   : > { %1215 = vmax.xlane.f32.xlu1 %v2612_v8  ;;  %1209 = vmax.xlane.f32.xlu0 %v2616_v7  ;;  %v1908_v10 = vpop.f32.mrf.mxu0  ;;  %v1920_v21 = vpop.f32.mrf.mxu1 }
 0x34b   : > { %v2636_v13 = vsel %vm1176_vm0, %v1116_v41, -1e+30  ;;  %v1131_v44 = vadd.f32 %v1908_v10, %v1566_v58  ;;  %v2646_v15 = vsel %vm1176_vm0, %v1156_v43, -1e+30  ;;  %v1171_v23 = vadd.f32 %v1920_v21, %v1566_v58 }
 0x34c   : > { %v1125_v20 = vpop.f32.mrf.mxu0  ;;  %v1165_v22 = vpop.f32.mrf.mxu1 }
 0x34d   : > { %v1126_v45 = vadd.f32 %v1566_v58, %v1125_v20  ;;  %v1166_v46 = vadd.f32 %v1566_v58, %v1165_v22  ;;  %v2652_v47 = vsel %vm1176_vm0, %v1131_v44, -1e+30  ;;  %v2662_v49 = vsel %vm1176_vm0, %v1171_v23, -1e+30 }
 0x34e   : > { %1197 = vmax.xlane.f32.xlu1 %v2622_v11  ;;  %1213 = vmax.xlane.f32.xlu0 %v2626_v18 }
 0x34f   : > { %v2656_v48 = vsel %vm1176_vm0, %v1126_v45, -1e+30  ;;  %v2666_v50 = vsel %vm1176_vm0, %v1166_v46, -1e+30 }
 0x352   : > { %1203 = vmax.xlane.f32.xlu1 %v2632_v12  ;;  %1201 = vmax.xlane.f32.xlu0 %v2636_v13 }
 0x356   : > { %1219 = vmax.xlane.f32.xlu1 %v2642_v14  ;;  %1217 = vmax.xlane.f32.xlu0 %v2646_v15 }
 0x35a   : > { %1207 = vmax.xlane.f32.xlu1 %v2652_v47  ;;  %1205 = vmax.xlane.f32.xlu0 %v2656_v48 }
 0x35e   : > { %1223 = vmax.xlane.f32.xlu1 %v2662_v49  ;;  %1221 = vmax.xlane.f32.xlu0 %v2666_v50 }
 0x3cb   : > { %v2670_v26 = vpop.xlane.xlu1 %1211  ;;  %v2672_v34 = vpop.xlane.xlu0 %1195 }
 0x3cc   : > { %v1234_v27 = vsub.f32 %v2592_v36, %v2670_v26  ;;  %v1226_v51 = vsub.f32 %v2596_v29, %v2672_v34 }
 0x3ce   : > { %v1243_v35 = vmul.f32 1.442695, %v1226_v51  ;;  %v1259_v52 = vmul.f32 1.442695, %v1234_v27 }
 0x3cf   : > { %v2678_v24 = vpop.xlane.xlu1 %1199  ;;  %v2680_v32 = vpop.xlane.xlu0 %1193 }
 0x3d0   : > { %v1228_v53 = vsub.f32 %v2602_v2, %v2678_v24  ;;  %v1225_v25 = vsub.f32 %v2606_v3, %v2680_v32  ;;  %2079 = vpow2.f32 %v1243_v35 }
 0x3d1   : > { %2081 = vpow2.f32 %v1259_v52 }
 0x3d2   : > { %v1241_v33 = vmul.f32 1.442695, %v1225_v25  ;;  %v1247_v56 = vmul.f32 1.442695, %v1228_v53 }
 0x3d3   : > { %v2686_v54 = vpop.xlane.xlu1 %1215  ;;  %v2688_v55 = vpop.xlane.xlu0 %1209 }
 0x3d4   : > { %v1233_v57 = vsub.f32 %v2616_v7, %v2688_v55  ;;  %2083 = vpow2.f32 %v1241_v33  ;;  %v1236_v58 = vsub.f32 %v2612_v8, %v2686_v54 }
 0x3d5   : > { %2085 = vpow2.f32 %v1247_v56 }
 0x3d6   : > { %v1257_v59 = vmul.f32 1.442695, %v1233_v57  ;;  %v1263_v38 = vmul.f32 1.442695, %v1236_v58 }
 0x3d7   : > { %v2694_v60 = vpop.xlane.xlu1 %1197  ;;  %v2696_v61 = vpop.xlane.xlu0 %1213 }
 0x3d8   : > { %v1227_v30 = vsub.f32 %v2622_v11, %v2694_v60  ;;  %2087 = vpow2.f32 %v1257_v59  ;;  %v1235_v28 = vsub.f32 %v2626_v18, %v2696_v61 }
 0x3da   : > { %v1245_v31 = vmul.f32 1.442695, %v1227_v30  ;;  %v1261_v63 = vmul.f32 1.442695, %v1235_v28 }
 0x3db   : > { %v2702_v37 = vpop.xlane.xlu1 %1203  ;;  %v2704_v39 = vpop.xlane.xlu0 %1201 }
 0x3dc   : > { %2089 = vpow2.f32 %v1245_v31  ;;  %v1230_v62 = vsub.f32 %v2632_v12, %v2702_v37  ;;  %v1229_v0 = vsub.f32 %v2636_v13, %v2704_v39 }
 0x3dd   : > { %2091 = vpow2.f32 %v1263_v38  ;;  %v2080_v1 = vpop.eup %2079 }
 0x3de   : > { %v1251_v4 = vmul.f32 1.442695, %v1230_v62  ;;  %1275 = vadd.xlane.f32.xlu1 %v2080_v1  ;;  %v2082_v17 = vpop.eup %2081  ;;  %v1249_v6 = vmul.f32 1.442695, %v1229_v0 }
 0x3df   : > { %v2710_v5 = vpop.xlane.xlu1 %1219  ;;  %v2712_v9 = vpop.xlane.xlu0 %1217 }
 0x3e0   : > { %2093 = vpow2.f32 %v1251_v4  ;;  %v1238_v16 = vsub.f32 %v2642_v14, %v2710_v5  ;;  %v1237_v40 = vsub.f32 %v2646_v15, %v2712_v9 }
 0x3e1   : > { %2095 = vpow2.f32 %v1261_v63  ;;  %v2084_v41 = vpop.eup %2083 }
 0x3e2   : > { %v1267_v42 = vmul.f32 1.442695, %v1238_v16  ;;  %1291 = vadd.xlane.f32.xlu1 %v2082_v17  ;;  %1273 = vadd.xlane.f32.xlu0 %v2084_v41  ;;  %v2086_v20 = vpop.eup %2085  ;;  %v1265_v21 = vmul.f32 1.442695, %v1237_v40 }
 0x3e3   : > { %v2718_v10 = vpop.xlane.xlu1 %1207  ;;  %v2720_v19 = vpop.xlane.xlu0 %1205 }
 0x3e4   : > { %2097 = vpow2.f32 %v1267_v42  ;;  %v1232_v43 = vsub.f32 %v2652_v47, %v2718_v10  ;;  %v1231_v44 = vsub.f32 %v2656_v48, %v2720_v19 }
 0x3e5   : > { %2099 = vpow2.f32 %v1249_v6  ;;  %v2088_v45 = vpop.eup %2087 }
 0x3e6   : > { %v1255_v22 = vmul.f32 1.442695, %v1232_v43  ;;  %1279 = vadd.xlane.f32.xlu1 %v2086_v20  ;;  %1289 = vadd.xlane.f32.xlu0 %v2088_v45  ;;  %v1253_v35 = vmul.f32 1.442695, %v1231_v44 }
 0x3e7   : > { %v2726_v23 = vpop.xlane.xlu1 %1223  ;;  %v2728_v46 = vpop.xlane.xlu0 %1221 }
 0x3e8   : > { %2101 = vpow2.f32 %v1255_v22  ;;  %v1240_v27 = vsub.f32 %v2662_v49, %v2726_v23  ;;  %v1239_v52 = vsub.f32 %v2666_v50, %v2728_v46 }
 0x3e9   : > { %v2090_v51 = vpop.eup %2089  ;;  %2103 = vpow2.f32 %v1265_v21 }
 0x3ea   : > { %v2092_v53 = vpop.eup %2091  ;;  %v1271_v25 = vmul.f32 1.442695, %v1240_v27  ;;  %1277 = vadd.xlane.f32.xlu0 %v2090_v51  ;;  %v1269_v56 = vmul.f32 1.442695, %v1239_v52 }
 0x3eb   : > { %1295 = vadd.xlane.f32.xlu1 %v2092_v53 }
 0x3ec   : > { %2105 = vpow2.f32 %v1271_v25 }
 0x3ed   : > { %v2094_v33 = vpop.eup %2093  ;;  %2107 = vpow2.f32 %v1253_v35 }
 0x3ee   : > { %v2096_v57 = vpop.eup %2095  ;;  %2109 = vpow2.f32 %v1269_v56 }
 0x3ef   : > { %1283 = vadd.xlane.f32.xlu1 %v2094_v33  ;;  %1293 = vadd.xlane.f32.xlu0 %v2096_v57 }
 0x3f1   : > { %v2098_v58 = vpop.eup %2097 }
 0x3f2   : > { %v2100_v59 = vpop.eup %2099 }
 0x3f3   : > { %1299 = vadd.xlane.f32.xlu1 %v2098_v58  ;;  %1281 = vadd.xlane.f32.xlu0 %v2100_v59 }
 0x3f5   : > { %v2102_v30 = vpop.eup %2101 }
 0x3f6   : > { %v2104_v38 = vpop.eup %2103 }
 0x3f7   : > { %1287 = vadd.xlane.f32.xlu1 %v2102_v30  ;;  %1297 = vadd.xlane.f32.xlu0 %v2104_v38 }
 0x3f9   : > { %v2106_v28 = vpop.eup %2105 }
 0x3fa   : > { %v2108_v31 = vpop.eup %2107 }
 0x3fb   : > { %1303 = vadd.xlane.f32.xlu1 %v2106_v28  ;;  %1285 = vadd.xlane.f32.xlu0 %v2108_v31  ;;  %v2110_v62 = vpop.eup %2109 }
 0x3ff   : > { %1301 = vadd.xlane.f32.xlu0 %v2110_v62 }
 0x467   : > { %v1276_v63 = vpop.xlane.xlu1 %1275 }
 0x468   : > { %2111 = vlog2.f32 %v1276_v63 }
 0x46b   : > { %v1292_v0 = vpop.xlane.xlu1 %1291  ;;  %v1274_v1 = vpop.xlane.xlu0 %1273 }
 0x46c   : > { %2113 = vlog2.f32 %v1292_v0 }
 0x46d   : > { %2115 = vlog2.f32 %v1274_v1 }
 0x46f   : > { %v1280_v4 = vpop.xlane.xlu1 %1279  ;;  %v1290_v16 = vpop.xlane.xlu0 %1289 }
 0x470   : > { %2117 = vlog2.f32 %v1280_v4 }
 0x471   : > { %2119 = vlog2.f32 %v1290_v16 }
 0x473   : > { %v1278_v6 = vpop.xlane.xlu0 %1277 }
 0x474   : > { %v1296_v17 = vpop.xlane.xlu1 %1295 }
 0x475   : > { %2121 = vlog2.f32 %v1296_v17  ;;  %v2112_v40 = vpop.eup %2111 }
 0x476   : > { %2123 = vlog2.f32 %v1278_v6  ;;  %v1308_v41 = vmul.f32 0.6931472, %v2112_v40 }
 0x478   : > { %v1284_v42 = vpop.xlane.xlu1 %1283  ;;  %v1294_v43 = vpop.xlane.xlu0 %1293  ;;  %v1338_v20 = vadd.f32 %v1308_v41, %v2672_v34 }
 0x479   : > { %2125 = vlog2.f32 %v1284_v42  ;;  %v2114_v21 = vpop.eup %2113 }
 0x47a   : > { %2127 = vlog2.f32 %v1294_v43  ;;  %v2116_v44 = vpop.eup %2115  ;;  %v1354_v45 = vsub.f32 %v2596_v29, %v1338_v20  ;;  %v1324_v22 = vmul.f32 0.6931472, %v2114_v21 }
 0x47b   : > { %v1306_v27 = vmul.f32 0.6931472, %v2116_v44 }
 0x47c   : > { %v1300_v51 = vpop.xlane.xlu1 %1299  ;;  %v1282_v35 = vpop.xlane.xlu0 %1281  ;;  %1371 = vst [vmem:[#allocation12 + $0x8] sm:$0xff] %v1354_v45  ;;  %v1346_v52 = vadd.f32 %v1324_v22, %v2670_v26 }
 0x47d   : > { %2129 = vlog2.f32 %v1300_v51  ;;  %v2118_v53 = vpop.eup %2117  ;;  %v1337_v25 = vadd.f32 %v1306_v27, %v2680_v32 }
 0x47e   : > { %2131 = vlog2.f32 %v1282_v35  ;;  %v2120_v33 = vpop.eup %2119  ;;  %v1362_v34 = vsub.f32 %v2592_v36, %v1346_v52  ;;  %v1312_v56 = vmul.f32 0.6931472, %v2118_v53 }
 0x47f   : > { %v1353_v57 = vsub.f32 %v2606_v3, %v1337_v25  ;;  %v1322_v58 = vmul.f32 0.6931472, %v2120_v33 }
 0x480   : > { %v1288_v29 = vpop.xlane.xlu1 %1287  ;;  %v1298_v59 = vpop.xlane.xlu0 %1297  ;;  %1379 = vst [vmem:[#allocation12 + $0x48] sm:$0xff] %v1362_v34  ;;  %v1340_v30 = vadd.f32 %v1312_v56, %v2678_v24 }
 0x481   : > { %2133 = vlog2.f32 %v1288_v29  ;;  %1370 = vst [vmem:[#allocation12] sm:$0xff] %v1353_v57  ;;  %v1345_v26 = vadd.f32 %v1322_v58, %v2688_v55 }
 0x482   : > { %v2122_v38 = vpop.eup %2121  ;;  %2135 = vlog2.f32 %v1298_v59  ;;  %v1356_v28 = vsub.f32 %v2602_v2, %v1340_v30 }
 0x483   : > { %v2124_v32 = vpop.eup %2123  ;;  %v1328_v31 = vmul.f32 0.6931472, %v2122_v38  ;;  %v1361_v36 = vsub.f32 %v2616_v7, %v1345_v26 }
 0x484   : > { %v1310_v62 = vmul.f32 0.6931472, %v2124_v32  ;;  %v1304_v3 = vpop.xlane.xlu1 %1303  ;;  %v1286_v63 = vpop.xlane.xlu0 %1285  ;;  %1373 = vst [vmem:[#allocation12 + $0x18] sm:$0xff] %v1356_v28 }
 0x485   : > { %v1348_v0 = vadd.f32 %v1328_v31, %v2686_v54  ;;  %2137 = vlog2.f32 %v1304_v3  ;;  %1378 = vst [vmem:[#allocation12 + $0x40] sm:$0xff] %v1361_v36 }
 0x486   : > { %v2126_v24 = vpop.eup %2125  ;;  %v1339_v1 = vadd.f32 %v1310_v62, %v2694_v60  ;;  %2139 = vlog2.f32 %v1286_v63 }
 0x487   : > { %v2128_v55 = vpop.eup %2127  ;;  %v1364_v4 = vsub.f32 %v2612_v8, %v1348_v0  ;;  %v1316_v16 = vmul.f32 0.6931472, %v2126_v24 }
 0x488   : > { %v1355_v2 = vsub.f32 %v2622_v11, %v1339_v1  ;;  %v1326_v17 = vmul.f32 0.6931472, %v2128_v55  ;;  %v1302_v7 = vpop.xlane.xlu0 %1301 }
 0x489   : > { %1381 = vst [vmem:[#allocation12 + $0x58] sm:$0xff] %v1364_v4  ;;  %v1342_v6 = vadd.f32 %v1316_v16, %v2702_v37  ;;  %2141 = vlog2.f32 %v1302_v7 }
 0x48a   : > { %v2130_v40 = vpop.eup %2129  ;;  %1372 = vst [vmem:[#allocation12 + $0x10] sm:$0xff] %v1355_v2  ;;  %v1347_v54 = vadd.f32 %v1326_v17, %v2696_v61 }
 0x48b   : > { %v2132_v41 = vpop.eup %2131  ;;  %v1358_v60 = vsub.f32 %v2632_v12, %v1342_v6  ;;  %v1332_v42 = vmul.f32 0.6931472, %v2130_v40 }
 0x48c   : > { %v1363_v43 = vsub.f32 %v2626_v18, %v1347_v54  ;;  %v1314_v8 = vmul.f32 0.6931472, %v2132_v41 }
 0x48d   : > { %1375 = vst [vmem:[#allocation12 + $0x28] sm:$0xff] %v1358_v60  ;;  %v1350_v11 = vadd.f32 %v1332_v42, %v2710_v5 }
 0x48e   : > { %v2134_v20 = vpop.eup %2133  ;;  %1380 = vst [vmem:[#allocation12 + $0x50] sm:$0xff] %v1363_v43  ;;  %v1341_v21 = vadd.f32 %v1314_v8, %v2704_v39 }
 0x48f   : > { %v2136_v37 = vpop.eup %2135  ;;  %v1366_v44 = vsub.f32 %v2642_v14, %v1350_v11  ;;  %v1320_v45 = vmul.f32 0.6931472, %v2134_v20 }
 0x490   : > { %v1357_v61 = vsub.f32 %v2636_v13, %v1341_v21  ;;  %v1330_v22 = vmul.f32 0.6931472, %v2136_v37 }
 0x491   : > { %1383 = vst [vmem:[#allocation12 + $0x68] sm:$0xff] %v1366_v44  ;;  %v1344_v12 = vadd.f32 %v1320_v45, %v2718_v10 }
 0x492   : > { %v2138_v27 = vpop.eup %2137  ;;  %1374 = vst [vmem:[#allocation12 + $0x20] sm:$0xff] %v1357_v61  ;;  %v1349_v18 = vadd.f32 %v1330_v22, %v2712_v9 }
 0x493   : > { %v2140_v51 = vpop.eup %2139  ;;  %v1360_v5 = vsub.f32 %v2652_v47, %v1344_v12  ;;  %v1336_v35 = vmul.f32 0.6931472, %v2138_v27 }
 0x494   : > { %v1365_v39 = vsub.f32 %v2646_v15, %v1349_v18  ;;  %v1318_v52 = vmul.f32 0.6931472, %v2140_v51 }
 0x495   : > { %1377 = vst [vmem:[#allocation12 + $0x38] sm:$0xff] %v1360_v5  ;;  %v1352_v14 = vadd.f32 %v1336_v35, %v2726_v23 }
 0x496   : > { %v2142_v53 = vpop.eup %2141  ;;  %1382 = vst [vmem:[#allocation12 + $0x60] sm:$0xff] %v1365_v39  ;;  %v1343_v13 = vadd.f32 %v1318_v52, %v2720_v19 }
 0x497   : > { %v1368_v10 = vsub.f32 %v2662_v49, %v1352_v14  ;;  %v1334_v25 = vmul.f32 0.6931472, %v2142_v53 }
 0x498   : > { %v1359_v33 = vsub.f32 %v2656_v48, %v1343_v13 }
 0x499   : > { %1385 = vst [vmem:[#allocation12 + $0x78] sm:$0xff] %v1368_v10  ;;  %v1351_v9 = vadd.f32 %v1334_v25, %v2728_v46 }
 0x49a   : > { %1376 = vst [vmem:[#allocation12 + $0x30] sm:$0xff] %v1359_v33 }
 0x49b   : > { %v1367_v47 = vsub.f32 %v2666_v50, %v1351_v9 }
 0x49d   : > { %1384 = vst [vmem:[#allocation12 + $0x70] sm:$0xff] %v1367_v47 }
 0x49e PF: > { %p2768_p9 = scmp.eq.s32.totalorder %s1484_s21, 9  ;;  %s2319_s13 = smov [#allocation12]  }
 0x49f   : > { %s1392_s14 = sshll.u32 %s2319_s13, 4  ;;  %s1393_s14 = int_to_ptr.vmem [resolvable:$true] %s1392_s14 }
 0x4a0   : > { %s2247_s15 = scalar_lea.vmem %s1393_s14, 2048  ;;  %p2254_p6 = scmp.lt.s32.totalorder %s1393_s14, %s1393_s14 }
 0x4a1   : > { %p2248_p10 = scmp.ne.s32.totalorder %s1393_s14, %s2247_s15  ;;  %p2255_p13 = scmp.lt.s32.totalorder %s2247_s15, %s2247_s15 }
 0x4a3   : > { %p2249_p11 = pnand %p2248_p10, %p2768_p9  ;;  %p2256_p0 = por %p2255_p13, %p2254_p6 }
 0x4a5   : > { %p2250_p12 = pneg %p2249_p11 }
 0x4a7   : > { %p2257_p1 = pnand %p2256_p0, %p2250_p12 }
 0x4a9   : > { %2260 = shalt.err (!%p2257_p1)
}
 0x4aa   : > { %s2320_s16 = smov 128   ;;  %s2321_s21 = smov 8  }
 0x4ab   : > { %2002 = dma.vmem_to_hbm [thread:$0]  (%p2768_p9), %s1393_s14, 2048, %s2797_s5, [#allocation6], %s2320_s16, %s2320_s16, %s2321_s21  }
 0x4ac   : > { %2296 = dma.done.wait (%p2768_p9), [#allocation6], 2048  }
 0x4ad   : > { %2298 = vsyncadd (%p2768_p9), [#allocation6], 4294965248 }
 0x4ae PF: > { %s19_s20 = sadd.s32 1, %s2309_s20   ;;  %s2803_s18 = smov %s2305_s19 }
 0x4af   : > { %p16_p3 = scmp.ge.s32.totalorder %s19_s20, 12   ;;  %s2804_s19 = smov %s2806_s27 }
 0x4b1   :  { %18 = sbr.rel (!%p16_p3) target bundleno = 5 (0x5), region = 103 }
 0x4b6   :  { %1408 = vsyncpa [#allocation5], 1 }
 0x4b7   :  { %1410 = vsyncpa [#allocation5 + $0x1], 1 }
 0x4b8   :  { %1411 = vsyncpa [#allocation8], 1 }
 0x4b9   :  { %1412 = vsyncpa [#allocation11], 1 }
 0x4ba   :  { %1413 = vsyncpa [#allocation6], 1 }
 0x4bb   :  { %1415 = vsyncpa [#allocation6 + $0x1], 1 }

</bundles_post_ra>
